<compile_context>
chip_gen: v6e
topology: v6e:2x2x1
jax: 0.10.0
libtpu: 0.0.40
codegen_flags: <defaults>
</compile_context>

<pallas_src>
import functools

import numpy as np
import jax
import jax.numpy as jnp
from jax.experimental import pallas as pl
from jax.experimental.pallas import tpu as pltpu


def _ceil_mult(x, m):
    return ((x + m - 1) // m) * m


def _ceil128(x):
    return _ceil_mult(x, 128)


_VMEM_LIMIT = 32 * 1024 * 1024     # safe on v7x (64 MiB phys / 32 MiB scoped)


# ---------------------------------------------------------------------------
# Fused epilogue: bias + optional leaky_relu + optional (dx*sf | log_softmax)
# ---------------------------------------------------------------------------
def _epilogue(acc, brow, slope, final_cfg):
    acc = acc + brow                                   # (TM, tn) f32 + (1, tn)
    if slope is not None:                              # fused leaky_relu
        acc = jnp.where(acc >= 0, acc, slope * acc)
    if final_cfg is not None:                          # final GCN layer
        sf, ncls = final_cfg
        col = jax.lax.broadcasted_iota(jnp.int32, acc.shape, 1)
        is_cls = (col >= 3) & (col < 3 + ncls)
        masked = jnp.where(is_cls, acc, -1e30)
        mrow = jnp.max(masked, axis=-1, keepdims=True)
        e = jnp.where(is_cls, jnp.exp(acc - mrow), 0.0)
        ssum = jnp.sum(e, axis=-1, keepdims=True)
        logsm = (acc - mrow) - jnp.log(ssum)
        acc = jnp.where(col < 3, acc * sf, jnp.where(is_cls, logsm, 0.0))
    return acc


# ---------------------------------------------------------------------------
# Kernel 1: fused NodeFeatureNet MLP chain (weights resident in VMEM)
# ---------------------------------------------------------------------------
def _fc_chain_kernel(nb_ref, x6_ref,
                     wlc_ref, blc_ref, wlf_ref, blf_ref,
                     w1_ref, b1_ref, w2a_ref, w2b_ref, b2_ref,
                     w3_ref, b3_ref, o_ref):
    f32 = jnp.float32
    bf16 = jnp.bfloat16

    def lrelu(x):
        return jnp.where(x >= 0, x, 0.2 * x)

    # localconv: Conv3d over the full KxKxK cube == Linear on the flat cube
    zl = lrelu(jnp.dot(nb_ref[...], wlc_ref[...], preferred_element_type=f32)
               + blc_ref[...])
    # localfc
    zl = lrelu(jnp.dot(zl.astype(bf16), wlf_ref[...], preferred_element_type=f32)
               + blf_ref[...])
    # fc1 on [v, normal]
    zp = lrelu(jnp.dot(x6_ref[...], w1_ref[...], preferred_element_type=f32)
               + b1_ref[...])
    # fc2 on concat([zp, zl]) as a split-K two-operand stream (no concat)
    z2 = lrelu(jnp.dot(zp.astype(bf16), w2a_ref[...], preferred_element_type=f32)
               + jnp.dot(zl.astype(bf16), w2b_ref[...], preferred_element_type=f32)
               + b2_ref[...])
    # fc3
    z3 = lrelu(jnp.dot(z2.astype(bf16), w3_ref[...], preferred_element_type=f32)
               + b3_ref[...])
    # NOTE: padded rows (>= m) only carry finite bias garbage; they are never
    # read through A_hat (zero columns) and the final output is sliced to [:m].
    o_ref[...] = z3.astype(o_ref.dtype)


def fc_chain(nb_p, x6_p, fc, *, tm, out_dtype=jnp.bfloat16):
    """Fused NodeFeatureNet: grid only over M tiles; all weights VMEM-resident."""
    Mp, Knb = nb_p.shape
    _, K6 = x6_p.shape
    P2C = fc["w3"].shape[1]
    assert Mp % tm == 0 and Knb % 128 == 0 and K6 % 128 == 0 and P2C % 128 == 0

    def full(a):                                   # whole array, fetched once
        return pl.BlockSpec(a.shape, lambda i, nd=a.ndim: (0,) * nd)

    grid_spec = pltpu.PrefetchScalarGridSpec(
        num_scalar_prefetch=0,
        grid=(Mp // tm,),
        in_specs=[
            pl.BlockSpec((tm, Knb), lambda i: (i, 0)),
            pl.BlockSpec((tm, K6), lambda i: (i, 0)),
            full(fc["wlc"]), full(fc["blc"]),
            full(fc["wlf"]), full(fc["blf"]),
            full(fc["w1"]), full(fc["b1"]),
            full(fc["w2a"]), full(fc["w2b"]), full(fc["b2"]),
            full(fc["w3"]), full(fc["b3"]),
        ],
        out_specs=pl.BlockSpec((tm, P2C), lambda i: (i, 0)),
    )
    return pl.pallas_call(
        _fc_chain_kernel,
        out_shape=jax.ShapeDtypeStruct((Mp, P2C), out_dtype),
        grid_spec=grid_spec,
        compiler_params=pltpu.CompilerParams(
            dimension_semantics=("parallel",),
            vmem_limit_bytes=_VMEM_LIMIT),
    )(nb_p, x6_p,
      fc["wlc"], fc["blc"], fc["wlf"], fc["blf"],
      fc["w1"], fc["b1"], fc["w2a"], fc["w2b"], fc["b2"],
      fc["w3"], fc["b3"])


# ---------------------------------------------------------------------------
# Kernel 2: fused GCN layer  out = A_hat @ (X @ W) + b  (+ epilogue)
#   Block-sparse A, grouped/ragged flattened nonzero-block loop, X @ W fused.
# ---------------------------------------------------------------------------
def _gcn_layer_kernel(rows_ref, cols_ref, firsts_ref, lasts_ref,
                      x_ref, a_ref, w_ref, b_ref, o_ref, acc_ref,
                      *, slope, final_cfg):
    t = pl.program_id(1)

    @pl.when(firsts_ref[t] == 1)                  # new output row block
    def _():
        acc_ref[...] = jnp.zeros_like(acc_ref)

    # fused X @ W for the current column block (W tile resident across t sweep)
    xw = jnp.dot(x_ref[...], w_ref[...], preferred_element_type=jnp.float32)
    # block-sparse aggregation: acc += A_blk @ (X_blk @ W)
    acc_ref[...] += jnp.dot(a_ref[0], xw.astype(jnp.bfloat16),
                            preferred_element_type=jnp.float32)

    @pl.when(lasts_ref[t] == 1)                   # row block finished
    def _():
        o_ref[...] = _epilogue(acc_ref[...], b_ref[...], slope,
                               final_cfg).astype(o_ref.dtype)


def gcn_layer(rows, cols, firsts, lasts, a_packed, x, w, b, *,
              slope=None, final_cfg=None, out_dtype=jnp.bfloat16):
    """rows/cols/firsts/lasts: flattened nonzero (row_blk, col_blk) list,
    grouped by row block.  a_packed: (T, TM, TM) bf16 packed nonzero tiles."""
    x = x.astype(jnp.bfloat16)
    w = w.astype(jnp.bfloat16)
    T, TM, TM2 = a_packed.shape
    Mp, Kin = x.shape
    Kin2, Np = w.shape
    assert TM == TM2 and Kin == Kin2 and Mp % TM == 0
    assert Kin % 128 == 0 and Np % 128 == 0
    tn = 256 if Np % 256 == 0 else 128
    if final_cfg is not None:
        # fused log-softmax needs every class column inside ONE N tile
        assert tn == Np, "final epilogue requires a single N tile"
    if b is None:
        b = jnp.zeros((1, Np), jnp.float32)

    kernel = functools.partial(_gcn_layer_kernel, slope=slope,
                               final_cfg=final_cfg)
    grid_spec = pltpu.PrefetchScalarGridSpec(
        num_scalar_prefetch=4,
        grid=(Np // tn, T),
        in_specs=[
            # X column block (only fetched for blocks that actually exist)
            pl.BlockSpec((TM, Kin), lambda j, t, r, c, fs, ls: (c[t], 0)),
            # packed nonzero A_hat tile (contiguous sequential DMA)
            pl.BlockSpec((1, TM, TM), lambda j, t, r, c, fs, ls: (t, 0, 0)),
            # layer weight N tile: resident across the whole t sweep
            pl.BlockSpec((Kin, tn), lambda j, t, r, c, fs, ls: (0, j)),
            pl.BlockSpec((1, tn), lambda j, t, r, c, fs, ls: (0, j)),
        ],
        out_specs=pl.BlockSpec((TM, tn), lambda j, t, r, c, fs, ls: (r[t], j)),
        scratch_shapes=[pltpu.VMEM((TM, tn), jnp.float32)],
    )
    return pl.pallas_call(
        kernel,
        out_shape=jax.ShapeDtypeStruct((Mp, Np), out_dtype),
        grid_spec=grid_spec,
        compiler_params=pltpu.CompilerParams(
            dimension_semantics=("parallel", "arbitrary"),
            vmem_limit_bytes=_VMEM_LIMIT),
    )(rows, cols, firsts, lasts, x, a_packed, w, b)


# ---------------------------------------------------------------------------
# Plain-JAX glue (gather / scatter / small index math)
# ---------------------------------------------------------------------------
def _pad_to(a, Mp, Np, dtype=jnp.bfloat16):
    m, n = a.shape
    return jnp.zeros((Mp, Np), dtype).at[:m, :n].set(a.astype(dtype))


def _avg_pool3d_2(vol):
    D1, D2, D3 = vol.shape
    return vol.reshape(D1 // 2, 2, D2 // 2, 2, D3 // 2, 2).mean(axis=(1, 3, 5))


def _grid_sample_trilinear_border(vol, coords):
    """F.grid_sample(mode='bilinear', padding_mode='border', align_corners=True)."""
    D1, D2, D3 = vol.shape

    def unnorm(c, size):
        return (c + 1.0) * 0.5 * (size - 1)

    x = jnp.clip(unnorm(coords[:, 0], D3), 0.0, D3 - 1.0)
    y = jnp.clip(unnorm(coords[:, 1], D2), 0.0, D2 - 1.0)
    z = jnp.clip(unnorm(coords[:, 2], D1), 0.0, D1 - 1.0)
    x0 = jnp.floor(x); y0 = jnp.floor(y); z0 = jnp.floor(z)
    wx = x - x0; wy = y - y0; wz = z - z0

    def idx(f, size):
        return jnp.clip(f, 0, size - 1).astype(jnp.int32)

    x0i, x1i = idx(x0, D3), idx(x0 + 1, D3)
    y0i, y1i = idx(y0, D2), idx(y0 + 1, D2)
    z0i, z1i = idx(z0, D1), idx(z0 + 1, D1)

    def g(zi, yi, xi):
        return vol[zi, yi, xi]

    c000 = g(z0i, y0i, x0i); c001 = g(z0i, y0i, x1i)
    c010 = g(z0i, y1i, x0i); c011 = g(z0i, y1i, x1i)
    c100 = g(z1i, y0i, x0i); c101 = g(z1i, y0i, x1i)
    c110 = g(z1i, y1i, x0i); c111 = g(z1i, y1i, x1i)
    return ((1 - wz) * ((1 - wy) * ((1 - wx) * c000 + wx * c001)
                        + wy * ((1 - wx) * c010 + wx * c011))
            + wz * ((1 - wy) * ((1 - wx) * c100 + wx * c101)
                    + wy * ((1 - wx) * c110 + wx * c111)))


def _vertex_normals(verts, faces):
    # pytorch3d Meshes.verts_normals_packed() semantics
    v0 = verts[faces[:, 0]]
    v1 = verts[faces[:, 1]]
    v2 = verts[faces[:, 2]]
    n = jnp.zeros_like(verts)
    n = n.at[faces[:, 1]].add(jnp.cross(v2 - v1, v0 - v1))
    n = n.at[faces[:, 2]].add(jnp.cross(v0 - v2, v1 - v2))
    n = n.at[faces[:, 0]].add(jnp.cross(v1 - v0, v2 - v0))
    nrm = jnp.linalg.norm(n, axis=1, keepdims=True)
    return n / jnp.maximum(nrm, 1e-6)


# ---------------------------------------------------------------------------
# CSRVCV2 forward (functional mirror of the PyTorch module)
# ---------------------------------------------------------------------------
class CSRVCV2Pallas:
    def __init__(self, dim_h=128, kernel_size=5, n_scale=1, sf=0.1,
                 gnn_layers=5, num_classes=10, key=None):
        self.C = dim_h
        self.K = kernel_size
        self.Q = n_scale
        self.sf = sf
        self.L = gnn_layers
        self.num_classes = num_classes
        # fused log-softmax epilogue needs all class columns inside one N tile
        assert 3 + num_classes <= 256
        K = kernel_size
        grid = np.linspace(-K // 2, K // 2, K)          # matches the torch code
        grid_3d = np.stack(np.meshgrid(grid, grid, grid), axis=0)
        grid_3d = grid_3d.transpose(2, 1, 3, 0)
        self.x_shift = jnp.asarray(grid_3d.reshape(-1, 3), jnp.float32)
        self.params = self._init_params(key)
        self.class_logits = None

    # ---- parameter init (padded ONCE, bf16 weights + f32 biases) -----------
    def _init_params(self, key):
        C, K, Q = self.C, self.K, self.Q
        keys = jax.random.split(key, 5 + self.L)

        def lin(k, fin, fout, scale=0.1):
            kw, kb = jax.random.split(k)
            return (scale * jax.random.normal(kw, (fin, fout), jnp.float32),
                    scale * jax.random.normal(kb, (fout,), jnp.float32))

        def pad_w(W):
            fin, fout = W.shape
            return (jnp.zeros((_ceil128(fin), _ceil128(fout)), jnp.bfloat16)
                    .at[:fin, :fout].set(W.astype(jnp.bfloat16)))

        def pad_b(b):
            fout = b.shape[0]
            return jnp.zeros((1, _ceil128(fout)), jnp.float32).at[0, :fout].set(b)

        Wlc, blc = lin(keys[0], Q * K ** 3, C)          # Conv3d == Linear on cube
        Wlf, blf = lin(keys[1], C, C)
        W1, b1 = lin(keys[2], 6, C)
        W2, b2 = lin(keys[3], 2 * C, 4 * C)
        W3, b3 = lin(keys[4], 4 * C, 2 * C)
        fc = {
            "wlc": pad_w(Wlc), "blc": pad_b(blc),
            "wlf": pad_w(Wlf), "blf": pad_b(blf),
            "w1": pad_w(W1), "b1": pad_b(b1),
            "w2a": pad_w(W2[:C]), "w2b": pad_w(W2[C:]), "b2": pad_b(b2),
            "w3": pad_w(W3), "b3": pad_b(b3),
        }
        dims = [2 * C] + [C] * (self.L - 1) + [3 + self.num_classes]
        gcn = []
        for i in range(self.L):
            Wg, bg = lin(keys[5 + i], dims[i], dims[i + 1])
            gcn.append((pad_w(Wg), pad_b(bg)))
        return {"fc": fc, "gcn": gcn}

    # ---- set_data: volume pyramid + A_hat block-sparse packing -------------
    def set_data(self, x, V, f):
        # x: (1, m, 3), V: (1, 1, D1, D2, D3), f: (1, F, 3) int32
        assert x.shape[0] == 1 and f.shape[0] == 1
        self.f = f
        m = int(x.shape[1])
        self.m = m

        # padded row layout: TM_A=128 aggregation blocks, even M-tile count
        TMA = 128
        if m <= 128:
            Mp, TMM = 128, 128
        elif m <= 256:
            Mp, TMM = 256, 128
        else:
            TMM = 256
            Mp = _ceil_mult(m, 2 * TMM)       # even tile count (v7x dual TC)
        self.Mp, self.TMM, self.TMA = Mp, TMM, TMA

        D1, D2, D3 = int(V.shape[2]), int(V.shape[3]), int(V.shape[4])
        D = max(D1, D2, D3)
        self.D = float(D)
        self.rescale = jnp.asarray([D3 / D, D2 / D, D1 / D], jnp.float32)
        self.Vq = [V[0, 0]]
        for _ in range(1, self.Q):
            self.Vq.append(_avg_pool3d_2(self.Vq[-1]))

        # --- gcn_norm (symmetric) built on host; one self loop per node ------
        faces = np.asarray(f[0])
        src = np.concatenate([faces[:, 0], faces[:, 1], faces[:, 2],
                              np.arange(m)])
        dst = np.concatenate([faces[:, 1], faces[:, 2], faces[:, 0],
                              np.arange(m)])
        A = np.zeros((m, m), np.float32)
        np.add.at(A, (dst, src), 1.0)
        deg = A.sum(axis=1)
        dinv = np.where(deg > 0, 1.0 / np.sqrt(deg), 0.0)
        A_hat = (dinv[:, None] * A) * dinv[None, :]
        A_pad = np.zeros((Mp, Mp), np.float32)
        A_pad[:m, :m] = A_hat

        # --- block-sparse packing: only nonzero (TMA,TMA) tiles are kept -----
        # TODO(synk): RCM/BFS vertex reordering here would densify the blocks.
        nbk = Mp // TMA
        Ab = A_pad.reshape(nbk, TMA, nbk, TMA).transpose(0, 2, 1, 3)
        nz = np.abs(Ab).sum(axis=(2, 3)) > 0
        rows_l, cols_l, firsts_l, lasts_l, blocks_l = [], [], [], [], []
        for i in range(nbk):
            ids = np.nonzero(nz[i])[0]
            for k, c in enumerate(ids):
                rows_l.append(i)
                cols_l.append(int(c))
                firsts_l.append(1 if k == 0 else 0)
                lasts_l.append(1 if k == len(ids) - 1 else 0)
                blocks_l.append(Ab[i, c])
        assert len(rows_l) > 0
        self.blk_rows = jnp.asarray(np.asarray(rows_l, np.int32))
        self.blk_cols = jnp.asarray(np.asarray(cols_l, np.int32))
        self.blk_firsts = jnp.asarray(np.asarray(firsts_l, np.int32))
        self.blk_lasts = jnp.asarray(np.asarray(lasts_l, np.int32))
        self.A_blocks = jnp.asarray(np.stack(blocks_l), jnp.bfloat16)

    # ---- NodeFeatureNet -----------------------------------------------------
    def _cube_sampling(self, v):
        K, Q, m = self.K, self.Q, self.m
        cubes = []
        for q in range(Q):
            shift = self.x_shift / self.D * 2.0 * (2 ** q)          # (K^3, 3)
            xq = v[0][:, None, :] + shift[None, :, :]               # (m, K^3, 3)
            xq = xq.reshape(-1, 3) / self.rescale
            samp = _grid_sample_trilinear_border(self.Vq[q], xq)
            cubes.append(samp.reshape(m, K ** 3))
        nb = jnp.stack(cubes, axis=1)                                # (m, Q, K^3)
        return nb.reshape(m, Q * K ** 3)

    def _node_features(self, v):
        Mp, TMM = self.Mp, self.TMM
        qk3 = self.Q * self.K ** 3
        nb = self._cube_sampling(v)                                  # (m, Q*K^3)
        nb_p = _pad_to(nb, Mp, _ceil128(qk3))
        normal = _vertex_normals(v[0], self.f[0])                    # (m, 3)
        x6 = jnp.concatenate([v[0], normal], axis=1)                 # (m, 6)
        x6_p = _pad_to(x6, Mp, 128)
        # fused localconv->localfc, fc1, fc2(split-K), fc3 in ONE kernel
        return fc_chain(nb_p, x6_p, self.params["fc"], tm=TMM)       # (Mp, P2C)

    # ---- GNN ---------------------------------------------------------------
    def _gnn(self, x):
        ncls = self.num_classes
        out = None
        for i, (Wp, bp) in enumerate(self.params["gcn"]):
            last = (i == self.L - 1)
            if last:
                # A_hat @ (X@W) + b with fused dx*sf + log_softmax epilogue
                out = gcn_layer(self.blk_rows, self.blk_cols, self.blk_firsts,
                                self.blk_lasts, self.A_blocks, x, Wp, bp,
                                final_cfg=(self.sf, ncls),
                                out_dtype=jnp.float32)
            else:
                x = gcn_layer(self.blk_rows, self.blk_cols, self.blk_firsts,
                              self.blk_lasts, self.A_blocks, x, Wp, bp,
                              slope=0.2, out_dtype=jnp.bfloat16)
        dx = out[:self.m, :3]                     # already scaled by sf
        class_logits = out[:self.m, 3:3 + ncls]   # already log-softmaxed
        return dx, class_logits

    def forward(self, t, x):
        z = self._node_features(x)                # (Mp, P2C) padded bf16
        dx, logits = self._gnn(z)
        self.class_logits = logits
        return dx[None]                           # (1, m, 3)

    def get_class_logits(self):
        return self.class_logits


# ---------------------------------------------------------------------------
if __name__ == "__main__":
    key = jax.random.PRNGKey(0)
    k_model, k_vol = jax.random.split(key)

    C, K, Q, sf, layers, ncls = 32, 5, 1, 0.1, 3, 10

    # small closed mesh: octahedron (6 verts, 8 faces) inside a 16^3 volume
    verts = 0.5 * jnp.asarray(
        [[1, 0, 0], [-1, 0, 0], [0, 1, 0],
         [0, -1, 0], [0, 0, 1], [0, 0, -1]], jnp.float32)
    faces = jnp.asarray(
        [[0, 2, 4], [2, 1, 4], [1, 3, 4], [3, 0, 4],
         [2, 0, 5], [1, 2, 5], [3, 1, 5], [0, 3, 5]], jnp.int32)
    x = verts[None]                                  # (1, 6, 3)
    f = faces[None]                                  # (1, 8, 3)
    V = jax.random.normal(k_vol, (1, 1, 16, 16, 16), jnp.float32)

    model = CSRVCV2Pallas(dim_h=C, kernel_size=K, n_scale=Q, sf=sf,
                          gnn_layers=layers, num_classes=ncls, key=k_model)
    model.set_data(x, V, f)
    dx = model.forward(0.0, x)
    logits = model.get_class_logits()
    jax.block_until_ready((dx, logits))

    assert dx.shape == (1, 6, 3)
    assert logits.shape == (6, ncls)
    assert bool(jnp.all(jnp.isfinite(dx))) and bool(jnp.all(jnp.isfinite(logits)))
    # log-softmax rows must (approximately) sum to 1 in prob space
    assert bool(jnp.all(jnp.abs(jnp.exp(logits).sum(axis=1) - 1.0) < 1e-2))
    print("KERNEL_OK")
</pallas_src>

<mosaic_0001>
module attributes {stable_mosaic.version = 11 : i64} {
  func.func @_fc_chain_kernel(%arg0: i32, %arg1: memref<128x128xbf16, #tpu.memory_space<vmem>>, %arg2: memref<128x128xbf16, #tpu.memory_space<vmem>>, %arg3: memref<128x128xbf16, #tpu.memory_space<vmem>>, %arg4: memref<1x128xf32, #tpu.memory_space<vmem>>, %arg5: memref<128x128xbf16, #tpu.memory_space<vmem>>, %arg6: memref<1x128xf32, #tpu.memory_space<vmem>>, %arg7: memref<128x128xbf16, #tpu.memory_space<vmem>>, %arg8: memref<1x128xf32, #tpu.memory_space<vmem>>, %arg9: memref<128x128xbf16, #tpu.memory_space<vmem>>, %arg10: memref<128x128xbf16, #tpu.memory_space<vmem>>, %arg11: memref<1x128xf32, #tpu.memory_space<vmem>>, %arg12: memref<128x128xbf16, #tpu.memory_space<vmem>>, %arg13: memref<1x128xf32, #tpu.memory_space<vmem>>, %arg14: memref<128x128xbf16, #tpu.memory_space<vmem>>) attributes {dimension_semantics = [#tpu.dimension_semantics<parallel>], iteration_bounds = array<i64: 1>, scalar_prefetch = 0 : i64, scratch_operands = 0 : i64, tpu.core_type = #tpu.core_type<tc>, window_params = [{transform_indices = @transform_0, window_bounds = array<i64: 128, 128>}, {transform_indices = @transform_1, window_bounds = array<i64: 128, 128>}, {pipeline_mode = #tpu.pipeline_mode<synchronous>, transform_indices = @transform_2, window_bounds = array<i64: 128, 128>}, {pipeline_mode = #tpu.pipeline_mode<synchronous>, transform_indices = @transform_3, window_bounds = array<i64: 1, 128>}, {pipeline_mode = #tpu.pipeline_mode<synchronous>, transform_indices = @transform_4, window_bounds = array<i64: 128, 128>}, {pipeline_mode = #tpu.pipeline_mode<synchronous>, transform_indices = @transform_5, window_bounds = array<i64: 1, 128>}, {pipeline_mode = #tpu.pipeline_mode<synchronous>, transform_indices = @transform_6, window_bounds = array<i64: 128, 128>}, {pipeline_mode = #tpu.pipeline_mode<synchronous>, transform_indices = @transform_7, window_bounds = array<i64: 1, 128>}, {pipeline_mode = #tpu.pipeline_mode<synchronous>, transform_indices = @transform_8, window_bounds = array<i64: 128, 128>}, {pipeline_mode = #tpu.pipeline_mode<synchronous>, transform_indices = @transform_9, window_bounds = array<i64: 128, 128>}, {pipeline_mode = #tpu.pipeline_mode<synchronous>, transform_indices = @transform_10, window_bounds = array<i64: 1, 128>}, {pipeline_mode = #tpu.pipeline_mode<synchronous>, transform_indices = @transform_11, window_bounds = array<i64: 128, 128>}, {pipeline_mode = #tpu.pipeline_mode<synchronous>, transform_indices = @transform_12, window_bounds = array<i64: 1, 128>}, {transform_indices = @transform_13, window_bounds = array<i64: 128, 128>}]} {
    %c0 = arith.constant 0 : index
    %c0_0 = arith.constant 0 : index
    %0 = vector.load %arg1[%c0, %c0_0] : memref<128x128xbf16, #tpu.memory_space<vmem>>, vector<128x128xbf16>
    %c0_1 = arith.constant 0 : index
    %c0_2 = arith.constant 0 : index
    %1 = vector.load %arg3[%c0_1, %c0_2] : memref<128x128xbf16, #tpu.memory_space<vmem>>, vector<128x128xbf16>
    %cst = arith.constant dense<0.000000e+00> : vector<128x128xf32>
    %2 = tpu.matmul %0, %1, %cst {dimension_numbers = #tpu.dot_dimension_numbers<[1], [0], [0], [1], [0, 0, 1, 1], [], []>} : vector<128x128xbf16>, vector<128x128xbf16>, vector<128x128xf32> -> vector<128x128xf32>
    %c0_3 = arith.constant 0 : index
    %c0_4 = arith.constant 0 : index
    %3 = vector.load %arg4[%c0_3, %c0_4] : memref<1x128xf32, #tpu.memory_space<vmem>>, vector<1x128xf32>
    %4 = vector.broadcast %3 : vector<1x128xf32> to vector<128x128xf32>
    %5 = arith.addf %2, %4 : vector<128x128xf32>
    %cst_5 = arith.constant 0.000000e+00 : f32
    %6 = vector.broadcast %cst_5 : f32 to vector<128x128xf32>
    %7 = arith.cmpf oge, %5, %6 : vector<128x128xf32>
    %cst_6 = arith.constant 2.000000e-01 : f32
    %8 = vector.broadcast %cst_6 : f32 to vector<128x128xf32>
    %9 = arith.mulf %8, %5 : vector<128x128xf32>
    %10 = arith.select %7, %5, %9 : vector<128x128xi1>, vector<128x128xf32>
    %11 = arith.truncf %10 : vector<128x128xf32> to vector<128x128xbf16>
    %c0_7 = arith.constant 0 : index
    %c0_8 = arith.constant 0 : index
    %12 = vector.load %arg5[%c0_7, %c0_8] : memref<128x128xbf16, #tpu.memory_space<vmem>>, vector<128x128xbf16>
    %cst_9 = arith.constant dense<0.000000e+00> : vector<128x128xf32>
    %13 = tpu.matmul %11, %12, %cst_9 {dimension_numbers = #tpu.dot_dimension_numbers<[1], [0], [0], [1], [0, 0, 1, 1], [], []>} : vector<128x128xbf16>, vector<128x128xbf16>, vector<128x128xf32> -> vector<128x128xf32>
    %c0_10 = arith.constant 0 : index
    %c0_11 = arith.constant 0 : index
    %14 = vector.load %arg6[%c0_10, %c0_11] : memref<1x128xf32, #tpu.memory_space<vmem>>, vector<1x128xf32>
    %15 = vector.broadcast %14 : vector<1x128xf32> to vector<128x128xf32>
    %16 = arith.addf %13, %15 : vector<128x128xf32>
    %cst_12 = arith.constant 0.000000e+00 : f32
    %17 = vector.broadcast %cst_12 : f32 to vector<128x128xf32>
    %18 = arith.cmpf oge, %16, %17 : vector<128x128xf32>
    %cst_13 = arith.constant 2.000000e-01 : f32
    %19 = vector.broadcast %cst_13 : f32 to vector<128x128xf32>
    %20 = arith.mulf %19, %16 : vector<128x128xf32>
    %21 = arith.select %18, %16, %20 : vector<128x128xi1>, vector<128x128xf32>
    %c0_14 = arith.constant 0 : index
    %c0_15 = arith.constant 0 : index
    %22 = vector.load %arg2[%c0_14, %c0_15] : memref<128x128xbf16, #tpu.memory_space<vmem>>, vector<128x128xbf16>
    %c0_16 = arith.constant 0 : index
    %c0_17 = arith.constant 0 : index
    %23 = vector.load %arg7[%c0_16, %c0_17] : memref<128x128xbf16, #tpu.memory_space<vmem>>, vector<128x128xbf16>
    %cst_18 = arith.constant dense<0.000000e+00> : vector<128x128xf32>
    %24 = tpu.matmul %22, %23, %cst_18 {dimension_numbers = #tpu.dot_dimension_numbers<[1], [0], [0], [1], [0, 0, 1, 1], [], []>} : vector<128x128xbf16>, vector<128x128xbf16>, vector<128x128xf32> -> vector<128x128xf32>
    %c0_19 = arith.constant 0 : index
    %c0_20 = arith.constant 0 : index
    %25 = vector.load %arg8[%c0_19, %c0_20] : memref<1x128xf32, #tpu.memory_space<vmem>>, vector<1x128xf32>
    %26 = vector.broadcast %25 : vector<1x128xf32> to vector<128x128xf32>
    %27 = arith.addf %24, %26 : vector<128x128xf32>
    %cst_21 = arith.constant 0.000000e+00 : f32
    %28 = vector.broadcast %cst_21 : f32 to vector<128x128xf32>
    %29 = arith.cmpf oge, %27, %28 : vector<128x128xf32>
    %cst_22 = arith.constant 2.000000e-01 : f32
    %30 = vector.broadcast %cst_22 : f32 to vector<128x128xf32>
    %31 = arith.mulf %30, %27 : vector<128x128xf32>
    %32 = arith.select %29, %27, %31 : vector<128x128xi1>, vector<128x128xf32>
    %33 = arith.truncf %32 : vector<128x128xf32> to vector<128x128xbf16>
    %c0_23 = arith.constant 0 : index
    %c0_24 = arith.constant 0 : index
    %34 = vector.load %arg9[%c0_23, %c0_24] : memref<128x128xbf16, #tpu.memory_space<vmem>>, vector<128x128xbf16>
    %cst_25 = arith.constant dense<0.000000e+00> : vector<128x128xf32>
    %35 = tpu.matmul %33, %34, %cst_25 {dimension_numbers = #tpu.dot_dimension_numbers<[1], [0], [0], [1], [0, 0, 1, 1], [], []>} : vector<128x128xbf16>, vector<128x128xbf16>, vector<128x128xf32> -> vector<128x128xf32>
    %36 = arith.truncf %21 : vector<128x128xf32> to vector<128x128xbf16>
    %c0_26 = arith.constant 0 : index
    %c0_27 = arith.constant 0 : index
    %37 = vector.load %arg10[%c0_26, %c0_27] : memref<128x128xbf16, #tpu.memory_space<vmem>>, vector<128x128xbf16>
    %cst_28 = arith.constant dense<0.000000e+00> : vector<128x128xf32>
    %38 = tpu.matmul %36, %37, %cst_28 {dimension_numbers = #tpu.dot_dimension_numbers<[1], [0], [0], [1], [0, 0, 1, 1], [], []>} : vector<128x128xbf16>, vector<128x128xbf16>, vector<128x128xf32> -> vector<128x128xf32>
    %39 = arith.addf %35, %38 : vector<128x128xf32>
    %c0_29 = arith.constant 0 : index
    %c0_30 = arith.constant 0 : index
    %40 = vector.load %arg11[%c0_29, %c0_30] : memref<1x128xf32, #tpu.memory_space<vmem>>, vector<1x128xf32>
    %41 = vector.broadcast %40 : vector<1x128xf32> to vector<128x128xf32>
    %42 = arith.addf %39, %41 : vector<128x128xf32>
    %cst_31 = arith.constant 0.000000e+00 : f32
    %43 = vector.broadcast %cst_31 : f32 to vector<128x128xf32>
    %44 = arith.cmpf oge, %42, %43 : vector<128x128xf32>
    %cst_32 = arith.constant 2.000000e-01 : f32
    %45 = vector.broadcast %cst_32 : f32 to vector<128x128xf32>
    %46 = arith.mulf %45, %42 : vector<128x128xf32>
    %47 = arith.select %44, %42, %46 : vector<128x128xi1>, vector<128x128xf32>
    %48 = arith.truncf %47 : vector<128x128xf32> to vector<128x128xbf16>
    %c0_33 = arith.constant 0 : index
    %c0_34 = arith.constant 0 : index
    %49 = vector.load %arg12[%c0_33, %c0_34] : memref<128x128xbf16, #tpu.memory_space<vmem>>, vector<128x128xbf16>
    %cst_35 = arith.constant dense<0.000000e+00> : vector<128x128xf32>
    %50 = tpu.matmul %48, %49, %cst_35 {dimension_numbers = #tpu.dot_dimension_numbers<[1], [0], [0], [1], [0, 0, 1, 1], [], []>} : vector<128x128xbf16>, vector<128x128xbf16>, vector<128x128xf32> -> vector<128x128xf32>
    %c0_36 = arith.constant 0 : index
    %c0_37 = arith.constant 0 : index
    %51 = vector.load %arg13[%c0_36, %c0_37] : memref<1x128xf32, #tpu.memory_space<vmem>>, vector<1x128xf32>
    %52 = vector.broadcast %51 : vector<1x128xf32> to vector<128x128xf32>
    %53 = arith.addf %50, %52 : vector<128x128xf32>
    %cst_38 = arith.constant 0.000000e+00 : f32
    %54 = vector.broadcast %cst_38 : f32 to vector<128x128xf32>
    %55 = arith.cmpf oge, %53, %54 : vector<128x128xf32>
    %cst_39 = arith.constant 2.000000e-01 : f32
    %56 = vector.broadcast %cst_39 : f32 to vector<128x128xf32>
    %57 = arith.mulf %56, %53 : vector<128x128xf32>
    %58 = arith.select %55, %53, %57 : vector<128x128xi1>, vector<128x128xf32>
    %59 = arith.truncf %58 : vector<128x128xf32> to vector<128x128xbf16>
    %c0_40 = arith.constant 0 : index
    %c0_41 = arith.constant 0 : index
    %60 = vector.load %arg14[%c0_40, %c0_41] : memref<128x128xbf16, #tpu.memory_space<vmem>>, vector<128x128xbf16>
    tpu.vector_store %arg14[%c0_40, %c0_41], %59 {strides = array<i32>} : memref<128x128xbf16, #tpu.memory_space<vmem>>, vector<128x128xbf16>,
    return
  }
  func.func @transform_0(%arg0: i32) -> (i32, i32) {
    %c0_i32 = arith.constant 0 : i32
    %c0_i32_0 = arith.constant 0 : i32
    return %arg0, %c0_i32 : i32, i32
  }
  func.func @transform_1(%arg0: i32) -> (i32, i32) {
    %c0_i32 = arith.constant 0 : i32
    %c0_i32_0 = arith.constant 0 : i32
    return %arg0, %c0_i32 : i32, i32
  }
  func.func @transform_2(%arg0: i32) -> (i32, i32) {
    %c0_i32 = arith.constant 0 : i32
    %c0_i32_0 = arith.constant 0 : i32
    %c0_i32_1 = arith.constant 0 : i32
    return %c0_i32, %c0_i32_0 : i32, i32
  }
  func.func @transform_3(%arg0: i32) -> (i32, i32) {
    %c0_i32 = arith.constant 0 : i32
    %c0_i32_0 = arith.constant 0 : i32
    %c0_i32_1 = arith.constant 0 : i32
    return %c0_i32, %c0_i32_0 : i32, i32
  }
  func.func @transform_4(%arg0: i32) -> (i32, i32) {
    %c0_i32 = arith.constant 0 : i32
    %c0_i32_0 = arith.constant 0 : i32
    %c0_i32_1 = arith.constant 0 : i32
    return %c0_i32, %c0_i32_0 : i32, i32
  }
  func.func @transform_5(%arg0: i32) -> (i32, i32) {
    %c0_i32 = arith.constant 0 : i32
    %c0_i32_0 = arith.constant 0 : i32
    %c0_i32_1 = arith.constant 0 : i32
    return %c0_i32, %c0_i32_0 : i32, i32
  }
  func.func @transform_6(%arg0: i32) -> (i32, i32) {
    %c0_i32 = arith.constant 0 : i32
    %c0_i32_0 = arith.constant 0 : i32
    %c0_i32_1 = arith.constant 0 : i32
    return %c0_i32, %c0_i32_0 : i32, i32
  }
  func.func @transform_7(%arg0: i32) -> (i32, i32) {
    %c0_i32 = arith.constant 0 : i32
    %c0_i32_0 = arith.constant 0 : i32
    %c0_i32_1 = arith.constant 0 : i32
    return %c0_i32, %c0_i32_0 : i32, i32
  }
  func.func @transform_8(%arg0: i32) -> (i32, i32) {
    %c0_i32 = arith.constant 0 : i32
    %c0_i32_0 = arith.constant 0 : i32
    %c0_i32_1 = arith.constant 0 : i32
    return %c0_i32, %c0_i32_0 : i32, i32
  }
  func.func @transform_9(%arg0: i32) -> (i32, i32) {
    %c0_i32 = arith.constant 0 : i32
    %c0_i32_0 = arith.constant 0 : i32
    %c0_i32_1 = arith.constant 0 : i32
    return %c0_i32, %c0_i32_0 : i32, i32
  }
  func.func @transform_10(%arg0: i32) -> (i32, i32) {
    %c0_i32 = arith.constant 0 : i32
    %c0_i32_0 = arith.constant 0 : i32
    %c0_i32_1 = arith.constant 0 : i32
    return %c0_i32, %c0_i32_0 : i32, i32
  }
  func.func @transform_11(%arg0: i32) -> (i32, i32) {
    %c0_i32 = arith.constant 0 : i32
    %c0_i32_0 = arith.constant 0 : i32
    %c0_i32_1 = arith.constant 0 : i32
    return %c0_i32, %c0_i32_0 : i32, i32
  }
  func.func @transform_12(%arg0: i32) -> (i32, i32) {
    %c0_i32 = arith.constant 0 : i32
    %c0_i32_0 = arith.constant 0 : i32
    %c0_i32_1 = arith.constant 0 : i32
    return %c0_i32, %c0_i32_0 : i32, i32
  }
  func.func @transform_13(%arg0: i32) -> (i32, i32) {
    %c0_i32 = arith.constant 0 : i32
    %c0_i32_0 = arith.constant 0 : i32
    return %arg0, %c0_i32 : i32, i32
  }
}

</mosaic_0001>

<bundles_post_ra>
// kernel: tpu_custom_call.1
= control target key start
LH: loop header
LB: loop body
LE: loop exit
PB: predicated region body
PF: predicated region fallthrough
CT: control target
= control target key end

     0   :  { %18 = vsyncpa [#allocation3], 0  ;;  %s2620_s0 = inlined_call_operand.hbm [shape: bf16[128,128], index: 0, kind: input, shape index: {}]   ;;  %s2621_s1 = inlined_call_operand.hbm [shape: bf16[128,128], index: 1, kind: input, shape index: {}]   ;;  %s2622_s2 = inlined_call_operand.hbm [shape: bf16[128,128], index: 2, kind: input, shape index: {}]   ;;  %s2623_s3 = inlined_call_operand.vmem [shape: f32[1,128], index: 3, kind: input, shape index: {}]   ;;  %s2624_s4 = inlined_call_operand.hbm [shape: bf16[128,128], index: 4, kind: input, shape index: {}]   ;;  %s2625_s5 = inlined_call_operand.vmem [shape: f32[1,128], index: 5, kind: input, shape index: {}]   ;;  %s2626_s6 = inlined_call_operand.hbm [shape: bf16[128,128], index: 6, kind: input, shape index: {}]   ;;  %s2627_s7 = inlined_call_operand.vmem [shape: f32[1,128], index: 7, kind: input, shape index: {}]   ;;  %s2628_s8 = inlined_call_operand.hbm [shape: bf16[128,128], index: 8, kind: input, shape index: {}]   ;;  %s2629_s9 = inlined_call_operand.hbm [shape: bf16[128,128], index: 9, kind: input, shape index: {}]   ;;  %s2630_s10 = inlined_call_operand.vmem [shape: f32[1,128], index: 10, kind: input, shape index: {}]   ;;  %s2631_s11 = inlined_call_operand.hbm [shape: bf16[128,128], index: 11, kind: input, shape index: {}]   ;;  %s2632_s12 = inlined_call_operand.vmem [shape: f32[1,128], index: 12, kind: input, shape index: {}]   ;;  %s2633_s13 = inlined_call_operand.hbm [shape: bf16[128,128], index: 13, kind: output, shape index: {}]  }
   0x1   :  { %19 = vsyncpa [#allocation6], 0 }
   0x2   :  { %20 = vsyncpa [#allocation9], 0 }
   0x3   :  { %21 = vsyncpa [#allocation12], 0 }
   0x4   :  { %22 = vsyncpa [#allocation15], 0 }
   0x5   :  { %23 = vsyncpa [#allocation4], 0  ;;  %s2376_s25 = smov [#allocation5]   ;;  %s2377_s27 = smov [#allocation8]  }
   0x6   :  { %s41_s26 = sshll.u32 %s2376_s25, 4  ;;  %s67_s28 = sshll.u32 %s2377_s27, 4  ;;  %s42_s26 = int_to_ptr.vmem [resolvable:$true] %s41_s26  ;;  %s68_s28 = int_to_ptr.vmem [resolvable:$true] %s67_s28 }
   0x7   :  { %s2192_s29 = scalar_lea.vmem %s42_s26, 1024  ;;  %p2197_p1 = scmp.lt.s32.totalorder %s42_s26, %s42_s26 }
   0x8   :  { %p2193_p0 = scmp.ne.s32.totalorder %s42_s26, %s2192_s29  ;;  %p2198_p2 = scmp.lt.s32.totalorder %s2192_s29, %s2192_s29 }
   0xa   :  { %p2199_p3 = por %p2198_p2, %p2197_p1 }
   0xc   :  { %p2200_p4 = pnand %p2199_p3, %p2193_p0 }
   0xe   :  { %2203 = shalt.err (!%p2200_p4)
}
   0xf   :  { %s2378_s30 = smov 64   ;;  %s2379_s14 = smov 4  }
  0x10   :  { %47 = dma.hbm_to_vmem [thread:$0]  %s2621_s1, 1024, %s42_s26, [#allocation6], %s2378_s30, %s2378_s30, %s2379_s14  }
  0x11   :  { %s2212_s17 = scalar_lea.vmem %s68_s28, 1024  ;;  %p2217_p6 = scmp.lt.s32.totalorder %s68_s28, %s68_s28 }
  0x12   :  { %p2213_p5 = scmp.ne.s32.totalorder %s68_s28, %s2212_s17  ;;  %p2218_p7 = scmp.lt.s32.totalorder %s2212_s17, %s2212_s17 }
  0x14   :  { %p2219_p8 = por %p2218_p7, %p2217_p6 }
  0x16   :  { %p2220_p9 = pnand %p2219_p8, %p2213_p5 }
  0x18   :  { %2223 = shalt.err (!%p2220_p9)
}
  0x19   :  { %73 = dma.hbm_to_vmem [thread:$0]  %s2624_s4, 1024, %s68_s28, [#allocation9], %s2378_s30, %s2378_s30, %s2379_s14  }
  0x1a   :  { %s2380_s20 = smov [#allocation11]   ;;  %s2381_s22 = smov [#allocation2]  }
  0x1b   :  { %s95_s21 = sshll.u32 %s2380_s20, 4  ;;  %s29_s23 = sshll.u32 %s2381_s22, 4  ;;  %s96_s21 = int_to_ptr.vmem [resolvable:$true] %s95_s21  ;;  %s30_s23 = int_to_ptr.vmem [resolvable:$true] %s29_s23 }
  0x1c   :  { %s2232_s1 = scalar_lea.vmem %s96_s21, 1024  ;;  %p2237_p11 = scmp.lt.s32.totalorder %s96_s21, %s96_s21 }
  0x1d   :  { %p2233_p10 = scmp.ne.s32.totalorder %s96_s21, %s2232_s1  ;;  %p2238_p12 = scmp.lt.s32.totalorder %s2232_s1, %s2232_s1 }
  0x1f   :  { %p2239_p13 = por %p2238_p12, %p2237_p11 }
  0x21   :  { %p2240_p0 = pnand %p2239_p13, %p2233_p10 }
  0x23   :  { %2243 = shalt.err (!%p2240_p0)
}
  0x24   :  { %101 = dma.hbm_to_vmem [thread:$0]  %s2628_s8, 1024, %s96_s21, [#allocation12], %s2378_s30, %s2378_s30, %s2379_s14  }
  0x25   :  { %s2252_s4 = scalar_lea.vmem %s30_s23, 1024  ;;  %p2257_p2 = scmp.lt.s32.totalorder %s30_s23, %s30_s23 }
  0x26   :  { %p2253_p1 = scmp.ne.s32.totalorder %s30_s23, %s2252_s4  ;;  %p2258_p3 = scmp.lt.s32.totalorder %s2252_s4, %s2252_s4 }
  0x28   :  { %p2259_p4 = por %p2258_p3, %p2257_p2 }
  0x2a   :  { %p2260_p5 = pnand %p2259_p4, %p2253_p1 }
  0x2c   :  { %2263 = shalt.err (!%p2260_p5)
}
  0x2d   :  { %35 = dma.hbm_to_vmem [thread:$0]  %s2620_s0, 1024, %s30_s23, [#allocation3], %s2378_s30, %s2378_s30, %s2379_s14  }
  0x2e   :  { %s2382_s28 = smov [#allocation7]   ;;  %s2383_s15 = smov [#allocation10]  }
  0x2f   :  { %s53_s29 = sshll.u32 %s2382_s28, 4  ;;  %s81_s16 = sshll.u32 %s2383_s15, 4  ;;  %s54_s29 = int_to_ptr.vmem [resolvable:$true] %s53_s29  ;;  %s82_s16 = int_to_ptr.vmem [resolvable:$true] %s81_s16 }
  0x30   :  { %s2272_s8 = scalar_lea.vmem %s54_s29, 1024  ;;  %p2277_p7 = scmp.lt.s32.totalorder %s54_s29, %s54_s29 }
  0x31   :  { %p2273_p6 = scmp.ne.s32.totalorder %s54_s29, %s2272_s8  ;;  %p2278_p8 = scmp.lt.s32.totalorder %s2272_s8, %s2272_s8 }
  0x33   :  { %p2279_p9 = por %p2278_p8, %p2277_p7 }
  0x35   :  { %p2280_p10 = pnand %p2279_p9, %p2273_p6 }
  0x37   :  { %2283 = shalt.err (!%p2280_p10)
}
  0x38   :  { %59 = dma.hbm_to_vmem [thread:$0]  %s2622_s2, 1024, %s54_s29, [#allocation6], %s2378_s30, %s2378_s30, %s2379_s14  }
  0x39   :  { %s2292_s0 = scalar_lea.vmem %s82_s16, 1024  ;;  %p2297_p12 = scmp.lt.s32.totalorder %s82_s16, %s82_s16 }
  0x3a   :  { %p2293_p11 = scmp.ne.s32.totalorder %s82_s16, %s2292_s0  ;;  %p2298_p13 = scmp.lt.s32.totalorder %s2292_s0, %s2292_s0 }
  0x3c   :  { %p2299_p0 = por %p2298_p13, %p2297_p12 }
  0x3e   :  { %p2300_p1 = pnand %p2299_p0, %p2293_p11 }
  0x40   :  { %2303 = shalt.err (!%p2300_p1)
}
  0x41   :  { %87 = dma.hbm_to_vmem [thread:$0]  %s2626_s6, 1024, %s82_s16, [#allocation9], %s2378_s30, %s2378_s30, %s2379_s14  }
  0x42   :  { %s2384_s21 = smov [#allocation13]   ;;  %s2385_s23 = smov [#allocation14]  }
  0x43   :  { %s107_s22 = sshll.u32 %s2384_s21, 4  ;;  %s121_s1 = sshll.u32 %s2385_s23, 4  ;;  %s108_s22 = int_to_ptr.vmem [resolvable:$true] %s107_s22  ;;  %s122_s1 = int_to_ptr.vmem [resolvable:$true] %s121_s1 }
  0x44   :  { %s2312_s2 = scalar_lea.vmem %s108_s22, 1024  ;;  %p2317_p3 = scmp.lt.s32.totalorder %s108_s22, %s108_s22 }
  0x45   :  { %p2313_p2 = scmp.ne.s32.totalorder %s108_s22, %s2312_s2  ;;  %p2318_p4 = scmp.lt.s32.totalorder %s2312_s2, %s2312_s2 }
  0x47   :  { %p2319_p5 = por %p2318_p4, %p2317_p3 }
  0x49   :  { %p2320_p6 = pnand %p2319_p5, %p2313_p2 }
  0x4b   :  { %2323 = shalt.err (!%p2320_p6)
}
  0x4c   :  { %113 = dma.hbm_to_vmem [thread:$0]  %s2629_s9, 1024, %s108_s22, [#allocation12], %s2378_s30, %s2378_s30, %s2379_s14  }
  0x4d   :  { %s2332_s6 = scalar_lea.vmem %s122_s1, 1024  ;;  %p2337_p8 = scmp.lt.s32.totalorder %s122_s1, %s122_s1 }
  0x4e   :  { %p2333_p7 = scmp.ne.s32.totalorder %s122_s1, %s2332_s6  ;;  %p2338_p9 = scmp.lt.s32.totalorder %s2332_s6, %s2332_s6 }
  0x50   :  { %p2339_p10 = por %p2338_p9, %p2337_p8 }
  0x52   :  { %p2340_p11 = pnand %p2339_p10, %p2333_p7 }
  0x54   :  { %2343 = shalt.err (!%p2340_p11)
}
  0x55   :  { %127 = dma.hbm_to_vmem [thread:$0]  %s2631_s11, 1024, %s122_s1, [#allocation15], %s2378_s30, %s2378_s30, %s2379_s14  }
  0x56   :  { %2364 = dma.done.wait [#allocation3], 1024  }
  0x57   :  { %2365 = vsyncadd [#allocation3], 4294966272 }
  0x58   :  { %2366 = dma.done.wait [#allocation6], 2048  }
  0x59   :  { %2367 = vsyncadd [#allocation6], 4294965248 }
  0x5a   :  { %2368 = dma.done.wait [#allocation9], 2048  }
  0x5b   :  { %2369 = vsyncadd [#allocation9], 4294965248 }
  0x5c   :  { %2370 = dma.done.wait [#allocation12], 2048  }
  0x5d   :  { %2371 = vsyncadd [#allocation12], 4294965248 }
  0x5e   :  { %2372 = dma.done.wait [#allocation15], 1024  }
  0x5f   :  { %2373 = vsyncadd [#allocation15], 4294966272  ;;  %v2120_v0 = vld [vmem:[#allocation7 + $0x38] sm:$0xff]   ;;  %v2121_v1 = vld [vmem:[#allocation7 + $0x30] sm:$0xff]  }
  0x60   :  { %1917 = vmatprep.subr.bf16.mxu0 %v2120_v0  ;;  %v2122_v2 = vld [vmem:[#allocation7 + $0x28] sm:$0xff]   ;;  %v2123_v3 = vld [vmem:[#allocation7 + $0x20] sm:$0xff]   ;;  %v2124_v5 = vld [vmem:[#allocation7 + $0x18] sm:$0xff]  }
  0x61   :  { %1918 = vmatpush3.bf16.msra.mxu0 %v2120_v0  ;;  %v2128_v4 = vld [vmem:[#allocation2] sm:$0xff]   ;;  %v2125_v6 = vld [vmem:[#allocation7 + $0x10] sm:$0xff]   ;;  %v2126_v7 = vld [vmem:[#allocation7 + $0x8] sm:$0xff]  }
  0x62   :  { %1919 = vmatprep.subr.bf16.mxu0 %v2121_v1  ;;  %1933 = vmatprep.mubr.bf16.mxu0 %v2128_v4  ;;  %v2140_v8 = vld [vmem:[#allocation8 + $0x38] sm:$0xff]   ;;  %v2142_v9 = vld [vmem:[#allocation8 + $0x30] sm:$0xff]   ;;  %v2127_v10 = vld [vmem:[#allocation7] sm:$0xff]  }
  0x63   :  { %1949 = vmatprep.subr.bf16.mxu1 %v2140_v8  ;;  %v2144_v11 = vld [vmem:[#allocation8 + $0x28] sm:$0xff]   ;;  %v2136_v12 = vld [vmem:[#allocation10 + $0x38] sm:$0xff]   ;;  %v2146_v14 = vld [vmem:[#allocation8 + $0x20] sm:$0xff]  }
  0x64   :  { %1950 = vmatpush3.bf16.msra.mxu1 %v2140_v8  ;;  %v2129_v13 = vld [vmem:[#allocation2 + $0x8] sm:$0xff]   ;;  %v2130_v15 = vld [vmem:[#allocation2 + $0x10] sm:$0xff]   ;;  %v2148_v17 = vld [vmem:[#allocation8 + $0x18] sm:$0xff]  }
  0x65   :  { %1920 = vmatpush3.bf16.msra.mxu0 %v2121_v1  ;;  %1951 = vmatprep.subr.bf16.mxu1 %v2142_v9  ;;  %v2137_v16 = vld [vmem:[#allocation10 + $0x30] sm:$0xff]   ;;  %v2138_v18 = vld [vmem:[#allocation10 + $0x28] sm:$0xff]   ;;  %v2131_v19 = vld [vmem:[#allocation2 + $0x18] sm:$0xff]  }
  0x66   :  { %1921 = vmatprep.subr.bf16.mxu0 %v2122_v2  ;;  %v2132_v20 = vld [vmem:[#allocation2 + $0x20] sm:$0xff]   ;;  %v2141_v22 = vld [vmem:[#allocation10 + $0x18] sm:$0xff]   ;;  %v2133_v23 = vld [vmem:[#allocation2 + $0x28] sm:$0xff]  }
  0x67   :  { %v2139_v21 = vld [vmem:[#allocation10 + $0x20] sm:$0xff]   ;;  %v2134_v24 = vld [vmem:[#allocation2 + $0x30] sm:$0xff]   ;;  %v2145_v26 = vld [vmem:[#allocation10 + $0x8] sm:$0xff]  }
  0x68   :  { %1952 = vmatpush3.bf16.msra.mxu1 %v2142_v9  ;;  %v2143_v25 = vld [vmem:[#allocation10 + $0x10] sm:$0xff]   ;;  %v2135_v27 = vld [vmem:[#allocation2 + $0x38] sm:$0xff]   ;;  %v2149_v28 = vld [vmem:[#allocation5] sm:$0xff]  }
  0x69   :  { %1922 = vmatpush3.bf16.msra.mxu0 %v2122_v2  ;;  %1953 = vmatprep.subr.bf16.mxu1 %v2144_v11  ;;  %v2147_v29 = vld [vmem:[#allocation10] sm:$0xff]   ;;  %v2150_v30 = vld [vmem:[#allocation5 + $0x8] sm:$0xff]   ;;  %v2151_v31 = vld [vmem:[#allocation8 + $0x10] sm:$0xff]  }
  0x6a   :  { %1923 = vmatprep.subr.bf16.mxu0 %v2123_v3  ;;  %v2152_v32 = vld [vmem:[#allocation8 + $0x8] sm:$0xff]   ;;  %v2153_v33 = vld [vmem:[#allocation5 + $0x10] sm:$0xff]   ;;  %v2154_v34 = vld [vmem:[#allocation5 + $0x18] sm:$0xff]  }
  0x6b   :  { %v2155_v35 = vld [vmem:[#allocation8] sm:$0xff]   ;;  %v2157_v37 = vld [vmem:[#allocation5 + $0x28] sm:$0xff]   ;;  %v2158_v38 = vld [vmem:[#allocation5 + $0x30] sm:$0xff]  }
  0x6c   :  { %1954 = vmatpush3.bf16.msra.mxu1 %v2144_v11  ;;  %v2156_v36 = vld [vmem:[#allocation5 + $0x20] sm:$0xff]   ;;  %v2159_v39 = vld [vmem:[#allocation5 + $0x38] sm:$0xff]   ;;  %v2161_v41 = vld [vmem:[#allocation11 + $0x30] sm:$0xff]  }
  0x6d   :  { %1924 = vmatpush3.bf16.msra.mxu0 %v2123_v3  ;;  %1955 = vmatprep.subr.bf16.mxu1 %v2146_v14  ;;  %v2160_v40 = vld [vmem:[#allocation11 + $0x38] sm:$0xff]   ;;  %v2162_v43 = vld [vmem:[#allocation11 + $0x28] sm:$0xff]   ;;  %v2163_v44 = vld [vmem:[#allocation11 + $0x20] sm:$0xff]  }
  0x6e   :  { %1925 = vmatprep.subr.bf16.mxu0 %v2124_v5  ;;  %v2505_v42 = vld [vmem:[#allocation13 + $0x38] sm:$0xff]   ;;  %v2167_v46 = vld [vmem:[#allocation11 + $0x10] sm:$0xff]   ;;  %v2169_v47 = vld [vmem:[#allocation11 + $0x8] sm:$0xff]  }
  0x6f   :  { %v2165_v45 = vld [vmem:[#allocation11 + $0x18] sm:$0xff]   ;;  %v2171_v48 = vld [vmem:[#allocation11] sm:$0xff]  }
  0x70   :  { %1956 = vmatpush3.bf16.msra.mxu1 %v2146_v14  ;;  %v2511_v50 = vld [vmem:[%s2623_s3] ss:$0 sm:$0xff] }
  0x71   :  { %1926 = vmatpush3.bf16.msra.mxu0 %v2124_v5  ;;  %1957 = vmatprep.subr.bf16.mxu1 %v2148_v17 }
  0x72   :  { %1927 = vmatprep.subr.bf16.mxu0 %v2125_v6 }
  0x74   :  { %1958 = vmatpush3.bf16.msra.mxu1 %v2148_v17 }
  0x75   :  { %1928 = vmatpush3.bf16.msra.mxu0 %v2125_v6  ;;  %1959 = vmatprep.subr.bf16.mxu1 %v2151_v31 }
  0x76   :  { %1929 = vmatprep.subr.bf16.mxu0 %v2126_v7 }
  0x78   :  { %1960 = vmatpush3.bf16.msra.mxu1 %v2151_v31 }
  0x79   :  { %1930 = vmatpush3.bf16.msra.mxu0 %v2126_v7  ;;  %1961 = vmatprep.subr.bf16.mxu1 %v2152_v32 }
  0x7a   :  { %1931 = vmatprep.subr.bf16.mxu0 %v2127_v10 }
  0x7c   :  { %1962 = vmatpush3.bf16.msra.mxu1 %v2152_v32 }
  0x7d   :  { %1932 = vmatpush3.bf16.msra.mxu0 %v2127_v10  ;;  %1963 = vmatprep.subr.bf16.mxu1 %v2155_v35  ;;  %v2166_v10 = vld [vmem:[#allocation13 + $0x30] sm:$0xff]  }
  0x7e   :  { %1981 = vmatprep.subr.bf16.mxu0 %v2136_v12 }
  0x80   :  { %1934 = vmatmul.mubr.bf16.vlgmr.msra.gmra.mxu0 %v2129_v13  ;;  %1964 = vmatpush3.bf16.msra.mxu1 %v2155_v35 }
  0x81   :  { %1937 = vmatprep.mubr.bf16.mxu0 %v2130_v15  ;;  %1982 = vmatpush3.bf16.msra.mxu0 %v2136_v12 }
  0x82   :  { %1983 = vmatprep.subr.bf16.mxu0 %v2137_v16  ;;  %2013 = vmatprep.subr.bf16.mxu1 %v2505_v42 }
  0x85   :  { %1984 = vmatpush3.bf16.msra.mxu0 %v2137_v16 }
  0x86   :  { %1985 = vmatprep.subr.bf16.mxu0 %v2138_v18 }
  0x88   :  { %1938 = vmatmul.mubr.bf16.gmra.mxu0 %v2131_v19 }
  0x89   :  { %1941 = vmatprep.mubr.bf16.mxu0 %v2132_v20  ;;  %1986 = vmatpush3.bf16.msra.mxu0 %v2138_v18  ;;  %v2168_v18 = vld [vmem:[#allocation13 + $0x28] sm:$0xff]  }
  0x8a   :  { %1987 = vmatprep.subr.bf16.mxu0 %v2139_v21 }
  0x8d   :  { %1988 = vmatpush3.bf16.msra.mxu0 %v2139_v21 }
  0x8e   :  { %1989 = vmatprep.subr.bf16.mxu0 %v2141_v22 }
  0x90   :  { %1942 = vmatmul.mubr.bf16.gmra.mxu0 %v2133_v23 }
  0x91   :  { %1945 = vmatprep.mubr.bf16.mxu0 %v2134_v24  ;;  %1990 = vmatpush3.bf16.msra.mxu0 %v2141_v22 }
  0x92   :  { %1991 = vmatprep.subr.bf16.mxu0 %v2143_v25 }
  0x95   :  { %1992 = vmatpush3.bf16.msra.mxu0 %v2143_v25 }
  0x96   :  { %1993 = vmatprep.subr.bf16.mxu0 %v2145_v26 }
  0x98   :  { %1946 = vmatmul.mubr.bf16.gmra.mxu0 %v2135_v27 }
  0x99   :  { %1994 = vmatpush3.bf16.msra.mxu0 %v2145_v26  ;;  %1997 = vmatprep.mubr.bf16.mxu0 %v2149_v28 }
  0x9a   :  { %1995 = vmatprep.subr.bf16.mxu0 %v2147_v29 }
  0x9d   :  { %1996 = vmatpush3.bf16.msra.mxu0 %v2147_v29 }
  0x9e   :  { %2045 = vmatprep.subr.bf16.mxu0 %v2160_v40 }
  0xa0   :  { %1998 = vmatmul.mubr.bf16.vlgmr.msra.gmra.mxu0 %v2150_v30  ;;  %v2170_v30 = vld [vmem:[#allocation13 + $0x20] sm:$0xff]  }
  0xa1   :  { %2001 = vmatprep.mubr.bf16.mxu0 %v2153_v33  ;;  %2046 = vmatpush3.bf16.msra.mxu0 %v2160_v40 }
  0xa2   :  { %2047 = vmatprep.subr.bf16.mxu0 %v2161_v41 }
  0xa5   :  { %2048 = vmatpush3.bf16.msra.mxu0 %v2161_v41 }
  0xa6   :  { %2049 = vmatprep.subr.bf16.mxu0 %v2162_v43 }
  0xa8   :  { %2002 = vmatmul.mubr.bf16.gmra.mxu0 %v2154_v34 }
  0xa9   :  { %2005 = vmatprep.mubr.bf16.mxu0 %v2156_v36  ;;  %2050 = vmatpush3.bf16.msra.mxu0 %v2162_v43 }
  0xaa   :  { %2051 = vmatprep.subr.bf16.mxu0 %v2163_v44 }
  0xad   :  { %2052 = vmatpush3.bf16.msra.mxu0 %v2163_v44 }
  0xae   :  { %2053 = vmatprep.subr.bf16.mxu0 %v2165_v45 }
  0xb0   :  { %2006 = vmatmul.mubr.bf16.gmra.mxu0 %v2157_v37 }
  0xb1   :  { %2009 = vmatprep.mubr.bf16.mxu0 %v2158_v38  ;;  %2054 = vmatpush3.bf16.msra.mxu0 %v2165_v45  ;;  %v2172_v38 = vld [vmem:[#allocation13 + $0x18] sm:$0xff]  }
  0xb2   :  { %2055 = vmatprep.subr.bf16.mxu0 %v2167_v46 }
  0xb5   :  { %2056 = vmatpush3.bf16.msra.mxu0 %v2167_v46 }
  0xb6   :  { %2057 = vmatprep.subr.bf16.mxu0 %v2169_v47 }
  0xb8   :  { %2010 = vmatmul.mubr.bf16.gmra.mxu0 %v2159_v39 }
  0xb9   :  { %2058 = vmatpush3.bf16.msra.mxu0 %v2169_v47 }
  0xba   :  { %2059 = vmatprep.subr.bf16.mxu0 %v2171_v48 }
  0xbd   :  { %2060 = vmatpush3.bf16.msra.mxu0 %v2171_v48 }
 0x140   :  { %v1935_v49 = vpop.f32.mrf.mxu0 }
 0x141   :  { %v333_v53 = vadd.f32 %v1935_v49, %v2511_v50 }
 0x142   :  { %v324_v51 = vpop.f32.mrf.mxu0 }
 0x143   :  { %v325_v52 = vadd.f32 %v2511_v50, %v324_v51  ;;  %v405_v60 = vmul.f32 0.2, %v333_v53  ;;  %vm389_vm2 = vcmp.ge.f32.partialorder %v333_v53, 0.0 }
 0x144   :  { %v1936_v54 = vpop.f32.mrf.mxu0 }
 0x145   :  { %v336_v55 = vadd.f32 %v1936_v54, %v2511_v50  ;;  %v403_v57 = vmul.f32 0.2, %v325_v52  ;;  %vm387_vm1 = vcmp.ge.f32.partialorder %v325_v52, 0.0  ;;  %v421_v7 = vsel %vm389_vm2, %v333_v53, %v405_v60 }
 0x146   :  { %v327_v56 = vpop.f32.mrf.mxu0 }
 0x147   :  { %vm390_vm0 = vcmp.ge.f32.partialorder %v336_v55, 0.0  ;;  %v406_v58 = vmul.f32 0.2, %v336_v55  ;;  %v328_v59 = vadd.f32 %v2511_v50, %v327_v56  ;;  %v419_v2 = vsel %vm387_vm1, %v325_v52, %v403_v57 }
 0x148   :  { %v1939_v61 = vpop.f32.mrf.mxu0 }
 0x149   :  { %v404_v62 = vmul.f32 0.2, %v328_v59  ;;  %vm388_vm3 = vcmp.ge.f32.partialorder %v328_v59, 0.0  ;;  %v422_v0 = vsel %vm390_vm0, %v336_v55, %v406_v58  ;;  %v349_v4 = vadd.f32 %v1939_v61, %v2511_v50 }
 0x14a   :  { %v340_v63 = vpop.f32.mrf.mxu0  ;;  %v436_v9 = vpack.c.bf16 %v422_v0, %v421_v7 }
 0x14b   :  { %v341_v1 = vadd.f32 %v2511_v50, %v340_v63  ;;  %v420_v3 = vsel %vm388_vm3, %v328_v59, %v404_v62  ;;  %v409_v15 = vmul.f32 0.2, %v349_v4  ;;  %vm393_vm6 = vcmp.ge.f32.partialorder %v349_v4, 0.0  ;;  %v2533_v63 = vld [vmem:[%s2627_s7] ss:$0 sm:$0xff] }
 0x14c   :  { %v1940_v5 = vpop.f32.mrf.mxu0  ;;  %v435_v6 = vpack.c.bf16 %v420_v3, %v419_v2 }
 0x14d   :  { %v352_v8 = vadd.f32 %v1940_v5, %v2511_v50  ;;  %v407_v12 = vmul.f32 0.2, %v341_v1  ;;  %vm391_vm5 = vcmp.ge.f32.partialorder %v341_v1, 0.0  ;;  %v425_v27 = vsel %vm393_vm6, %v349_v4, %v409_v15 }
 0x14e   :  { %v343_v11 = vpop.f32.mrf.mxu0  ;;  %1965 = vmatprep.mubr.bf16.mxu1 %v435_v6 }
 0x14f   :  { %vm394_vm4 = vcmp.ge.f32.partialorder %v352_v8, 0.0  ;;  %v410_v13 = vmul.f32 0.2, %v352_v8  ;;  %v344_v14 = vadd.f32 %v2511_v50, %v343_v11  ;;  %1966 = vmatmul.mubr.bf16.vlgmr.msra.gmra.mxu1 %v436_v9  ;;  %v423_v22 = vsel %vm391_vm5, %v341_v1, %v407_v12 }
 0x150   :  { %v1943_v16 = vpop.f32.mrf.mxu0  ;;  %2014 = vmatpush3.bf16.msra.mxu1 %v2505_v42 }
 0x151   :  { %vm392_vm7 = vcmp.ge.f32.partialorder %v344_v14, 0.0  ;;  %v408_v17 = vmul.f32 0.2, %v344_v14  ;;  %2015 = vmatprep.subr.bf16.mxu1 %v2166_v10  ;;  %v426_v20 = vsel %vm394_vm4, %v352_v8, %v410_v13  ;;  %v365_v24 = vadd.f32 %v1943_v16, %v2511_v50 }
 0x152   :  { %v356_v19 = vpop.f32.mrf.mxu0  ;;  %v438_v29 = vpack.c.bf16 %v426_v20, %v425_v27 }
 0x153   :  { %v357_v21 = vadd.f32 %v2511_v50, %v356_v19  ;;  %v424_v23 = vsel %vm392_vm7, %v344_v14, %v408_v17  ;;  %v413_v35 = vmul.f32 0.2, %v365_v24  ;;  %vm397_vm10 = vcmp.ge.f32.partialorder %v365_v24, 0.0 }
 0x154   :  { %v1944_v25 = vpop.f32.mrf.mxu0  ;;  %v437_v26 = vpack.c.bf16 %v424_v23, %v423_v22  ;;  %2016 = vmatpush3.bf16.msra.mxu1 %v2166_v10 }
 0x155   :  { %v368_v28 = vadd.f32 %v1944_v25, %v2511_v50  ;;  %2017 = vmatprep.subr.bf16.mxu1 %v2168_v18  ;;  %v411_v32 = vmul.f32 0.2, %v357_v21  ;;  %vm395_vm9 = vcmp.ge.f32.partialorder %v357_v21, 0.0  ;;  %v429_v47 = vsel %vm397_vm10, %v365_v24, %v413_v35 }
 0x156   :  { %v359_v31 = vpop.f32.mrf.mxu0  ;;  %1969 = vmatprep.mubr.bf16.mxu1 %v437_v26 }
 0x157   :  { %vm398_vm8 = vcmp.ge.f32.partialorder %v368_v28, 0.0  ;;  %v414_v33 = vmul.f32 0.2, %v368_v28  ;;  %v360_v34 = vadd.f32 %v2511_v50, %v359_v31  ;;  %1970 = vmatmul.mubr.bf16.gmra.mxu1 %v438_v29  ;;  %v427_v42 = vsel %vm395_vm9, %v357_v21, %v411_v32 }
 0x158   :  { %v1947_v36 = vpop.f32.mrf.mxu0  ;;  %2018 = vmatpush3.bf16.msra.mxu1 %v2168_v18 }
 0x159   :  { %vm396_vm11 = vcmp.ge.f32.partialorder %v360_v34, 0.0  ;;  %v412_v37 = vmul.f32 0.2, %v360_v34  ;;  %2019 = vmatprep.subr.bf16.mxu1 %v2170_v30  ;;  %v430_v40 = vsel %vm398_vm8, %v368_v28, %v414_v33  ;;  %v381_v44 = vadd.f32 %v1947_v36, %v2511_v50  ;;  %v2173_v28 = vld [vmem:[#allocation13 + $0x10] sm:$0xff]   ;;  %v2174_v36 = vld [vmem:[#allocation13 + $0x8] sm:$0xff]  }
 0x15a   :  { %v372_v39 = vpop.f32.mrf.mxu0  ;;  %v440_v49 = vpack.c.bf16 %v430_v40, %v429_v47  ;;  %v2175_v47 = vld [vmem:[#allocation13] sm:$0xff]  }
 0x15b   :  { %v373_v41 = vadd.f32 %v2511_v50, %v372_v39  ;;  %v428_v43 = vsel %vm396_vm11, %v360_v34, %v412_v37  ;;  %v417_v55 = vmul.f32 0.2, %v381_v44  ;;  %vm401_vm14 = vcmp.ge.f32.partialorder %v381_v44, 0.0 }
 0x15c   :  { %v1948_v45 = vpop.f32.mrf.mxu0  ;;  %v439_v46 = vpack.c.bf16 %v428_v43, %v427_v42  ;;  %2020 = vmatpush3.bf16.msra.mxu1 %v2170_v30 }
 0x15d   :  { %v384_v48 = vadd.f32 %v1948_v45, %v2511_v50  ;;  %2021 = vmatprep.subr.bf16.mxu1 %v2172_v38  ;;  %v415_v52 = vmul.f32 0.2, %v373_v41  ;;  %vm399_vm13 = vcmp.ge.f32.partialorder %v373_v41, 0.0  ;;  %v433_v61 = vsel %vm401_vm14, %v381_v44, %v417_v55 }
 0x15e   :  { %v375_v51 = vpop.f32.mrf.mxu0  ;;  %1973 = vmatprep.mubr.bf16.mxu1 %v439_v46 }
 0x15f   :  { %vm402_vm12 = vcmp.ge.f32.partialorder %v384_v48, 0.0  ;;  %v418_v53 = vmul.f32 0.2, %v384_v48  ;;  %v376_v54 = vadd.f32 %v2511_v50, %v375_v51  ;;  %1974 = vmatmul.mubr.bf16.gmra.mxu1 %v440_v49  ;;  %v431_v58 = vsel %vm399_vm13, %v373_v41, %v415_v52 }
 0x160   :  { %2022 = vmatpush3.bf16.msra.mxu1 %v2172_v38  ;;  %v1999_v50 = vpop.f32.mrf.mxu0 }
 0x161   :  { %vm400_vm15 = vcmp.ge.f32.partialorder %v376_v54, 0.0  ;;  %v416_v56 = vmul.f32 0.2, %v376_v54  ;;  %v434_v57 = vsel %vm402_vm12, %v384_v48, %v418_v53  ;;  %v837_v0 = vadd.f32 %v1999_v50, %v2533_v63  ;;  %2023 = vmatprep.subr.bf16.mxu1 %v2173_v28 }
 0x162   :  { %v442_v62 = vpack.c.bf16 %v434_v57, %v433_v61  ;;  %v828_v1 = vpop.f32.mrf.mxu0 }
 0x163   :  { %v432_v59 = vsel %vm400_vm15, %v376_v54, %v416_v56  ;;  %v829_v2 = vadd.f32 %v2533_v63, %v828_v1  ;;  %v909_v3 = vmul.f32 0.2, %v837_v0  ;;  %vm893_vm0 = vcmp.ge.f32.partialorder %v837_v0, 0.0 }
 0x164   :  { %v441_v60 = vpack.c.bf16 %v432_v59, %v431_v58  ;;  %v2000_v4 = vpop.f32.mrf.mxu0  ;;  %2024 = vmatpush3.bf16.msra.mxu1 %v2173_v28 }
 0x165   :  { %v907_v5 = vmul.f32 0.2, %v829_v2  ;;  %v840_v6 = vadd.f32 %v2000_v4, %v2533_v63  ;;  %vm891_vm1 = vcmp.ge.f32.partialorder %v829_v2, 0.0  ;;  %v925_v10 = vsel %vm893_vm0, %v837_v0, %v909_v3  ;;  %2025 = vmatprep.subr.bf16.mxu1 %v2174_v36 }
 0x166   :  { %1977 = vmatprep.mubr.bf16.mxu1 %v441_v60  ;;  %v831_v7 = vpop.f32.mrf.mxu0 }
 0x167   :  { %1978 = vmatmul.mubr.bf16.gmra.mxu1 %v442_v62  ;;  %vm894_vm2 = vcmp.ge.f32.partialorder %v840_v6, 0.0  ;;  %v910_v8 = vmul.f32 0.2, %v840_v6  ;;  %v832_v9 = vadd.f32 %v2533_v63, %v831_v7  ;;  %v923_v14 = vsel %vm891_vm1, %v829_v2, %v907_v5 }
 0x168   :  { %v2003_v11 = vpop.f32.mrf.mxu0  ;;  %2026 = vmatpush3.bf16.msra.mxu1 %v2174_v36  ;;  %v2177_v36 = vld [vmem:[#allocation14 + $0x30] sm:$0xff]  }
 0x169   :  { %v926_v12 = vsel %vm894_vm2, %v840_v6, %v910_v8  ;;  %vm892_vm3 = vcmp.ge.f32.partialorder %v832_v9, 0.0  ;;  %v908_v13 = vmul.f32 0.2, %v832_v9  ;;  %v853_v19 = vadd.f32 %v2003_v11, %v2533_v63  ;;  %2027 = vmatprep.subr.bf16.mxu1 %v2175_v47  ;;  %v2176_v11 = vld [vmem:[#allocation14 + $0x38] sm:$0xff]  }
 0x16a   :  { %v844_v15 = vpop.f32.mrf.mxu0  ;;  %v940_v16 = vpack.c.bf16 %v926_v12, %v925_v10 }
 0x16b   :  { %v845_v17 = vadd.f32 %v2533_v63, %v844_v15  ;;  %v924_v18 = vsel %vm892_vm3, %v832_v9, %v908_v13  ;;  %v913_v26 = vmul.f32 0.2, %v853_v19  ;;  %vm897_vm5 = vcmp.ge.f32.partialorder %v853_v19, 0.0 }
 0x16c   :  { %v2004_v20 = vpop.f32.mrf.mxu0  ;;  %v939_v21 = vpack.c.bf16 %v924_v18, %v923_v14  ;;  %2028 = vmatpush3.bf16.msra.mxu1 %v2175_v47 }
 0x16d   :  { %v856_v22 = vadd.f32 %v2004_v20, %v2533_v63  ;;  %v911_v24 = vmul.f32 0.2, %v845_v17  ;;  %vm895_vm4 = vcmp.ge.f32.partialorder %v845_v17, 0.0  ;;  %v929_v38 = vsel %vm897_vm5, %v853_v19, %v913_v26  ;;  %2077 = vmatprep.subr.bf16.mxu1 %v2176_v11 }
 0x16e   :  { %v847_v23 = vpop.f32.mrf.mxu0  ;;  %2061 = vmatprep.mubr.bf16.mxu0 %v939_v21 }
 0x16f   :  { %v848_v25 = vadd.f32 %v2533_v63, %v847_v23  ;;  %2062 = vmatmul.mubr.bf16.vlgmr.msra.gmra.mxu0 %v940_v16  ;;  %v914_v29 = vmul.f32 0.2, %v856_v22  ;;  %vm898_vm7 = vcmp.ge.f32.partialorder %v856_v22, 0.0  ;;  %v927_v32 = vsel %vm895_vm4, %v845_v17, %v911_v24 }
 0x170   :  { %v2007_v27 = vpop.f32.mrf.mxu0 }
 0x171   :  { %vm896_vm6 = vcmp.ge.f32.partialorder %v848_v25, 0.0  ;;  %v912_v30 = vmul.f32 0.2, %v848_v25  ;;  %v869_v39 = vadd.f32 %v2007_v27, %v2533_v63  ;;  %v930_v40 = vsel %vm898_vm7, %v856_v22, %v914_v29 }
 0x172   :  { %v860_v31 = vpop.f32.mrf.mxu0  ;;  %v942_v44 = vpack.c.bf16 %v930_v40, %v929_v38 }
 0x173   :  { %v928_v33 = vsel %vm896_vm6, %v848_v25, %v912_v30  ;;  %v861_v34 = vadd.f32 %v2533_v63, %v860_v31  ;;  %v917_v48 = vmul.f32 0.2, %v869_v39  ;;  %vm901_vm10 = vcmp.ge.f32.partialorder %v869_v39, 0.0 }
 0x174   :  { %v2008_v35 = vpop.f32.mrf.mxu0  ;;  %v941_v37 = vpack.c.bf16 %v928_v33, %v927_v32 }
 0x175   :  { %v915_v42 = vmul.f32 0.2, %v861_v34  ;;  %vm899_vm8 = vcmp.ge.f32.partialorder %v861_v34, 0.0  ;;  %v872_v45 = vadd.f32 %v2008_v35, %v2533_v63  ;;  %v933_v59 = vsel %vm901_vm10, %v869_v39, %v917_v48 }
 0x176   :  { %v863_v41 = vpop.f32.mrf.mxu0  ;;  %2065 = vmatprep.mubr.bf16.mxu0 %v941_v37 }
 0x177   :  { %v864_v43 = vadd.f32 %v2533_v63, %v863_v41  ;;  %2066 = vmatmul.mubr.bf16.gmra.mxu0 %v942_v44  ;;  %vm902_vm11 = vcmp.ge.f32.partialorder %v872_v45, 0.0  ;;  %v918_v51 = vmul.f32 0.2, %v872_v45  ;;  %v931_v53 = vsel %vm899_vm8, %v861_v34, %v915_v42  ;;  %v2178_v44 = vld [vmem:[#allocation14 + $0x28] sm:$0xff]  }
 0x178   :  { %v2011_v46 = vpop.f32.mrf.mxu0 }
 0x179   :  { %vm900_vm9 = vcmp.ge.f32.partialorder %v864_v43, 0.0  ;;  %v916_v49 = vmul.f32 0.2, %v864_v43  ;;  %v885_v55 = vadd.f32 %v2011_v46, %v2533_v63  ;;  %v934_v60 = vsel %vm902_vm11, %v872_v45, %v918_v51 }
 0x17a   :  { %v876_v52 = vpop.f32.mrf.mxu0  ;;  %v944_v50 = vpack.c.bf16 %v934_v60, %v933_v59 }
 0x17b   :  { %v932_v54 = vsel %vm900_vm9, %v864_v43, %v916_v49  ;;  %v877_v56 = vadd.f32 %v2533_v63, %v876_v52  ;;  %v921_v2 = vmul.f32 0.2, %v885_v55  ;;  %vm905_vm13 = vcmp.ge.f32.partialorder %v885_v55, 0.0 }
 0x17c   :  { %v2012_v57 = vpop.f32.mrf.mxu0  ;;  %v943_v58 = vpack.c.bf16 %v932_v54, %v931_v53 }
 0x17d   :  { %v888_v61 = vadd.f32 %v2012_v57, %v2533_v63  ;;  %v919_v0 = vmul.f32 0.2, %v877_v56  ;;  %vm903_vm12 = vcmp.ge.f32.partialorder %v877_v56, 0.0  ;;  %v937_v8 = vsel %vm905_vm13, %v885_v55, %v921_v2  ;;  %v2179_v57 = vld [vmem:[#allocation14 + $0x20] sm:$0xff]  }
 0x17e   :  { %v879_v62 = vpop.f32.mrf.mxu0  ;;  %2069 = vmatprep.mubr.bf16.mxu0 %v943_v58 }
 0x17f   :  { %v880_v1 = vadd.f32 %v2533_v63, %v879_v62  ;;  %v922_v3 = vmul.f32 0.2, %v888_v61  ;;  %vm906_vm14 = vcmp.ge.f32.partialorder %v888_v61, 0.0  ;;  %2070 = vmatmul.mubr.bf16.gmra.mxu0 %v944_v50  ;;  %v935_v5 = vsel %vm903_vm12, %v877_v56, %v919_v0  ;;  %v2554_v63 = vld [vmem:[%s2625_s5] ss:$0 sm:$0xff] }
 0x181   :  { %vm904_vm15 = vcmp.ge.f32.partialorder %v880_v1, 0.0  ;;  %v920_v4 = vmul.f32 0.2, %v880_v1  ;;  %v938_v9 = vsel %vm906_vm14, %v888_v61, %v922_v3 }
 0x182   :  { %v946_v10 = vpack.c.bf16 %v938_v9, %v937_v8 }
 0x183   :  { %v936_v6 = vsel %vm904_vm15, %v880_v1, %v920_v4 }
 0x184   :  { %v945_v7 = vpack.c.bf16 %v936_v6, %v935_v5 }
 0x186   :  { %2073 = vmatprep.mubr.bf16.mxu0 %v945_v7 }
 0x187   :  { %2074 = vmatmul.mubr.bf16.gmra.mxu0 %v946_v10 }
 0x20f   :  { %v1967_v12 = vpop.f32.mrf.mxu1 }
 0x210   :  { %v557_v15 = vadd.f32 %v1967_v12, %v2554_v63 }
 0x211   :  { %v548_v13 = vpop.f32.mrf.mxu1 }
 0x212   :  { %v549_v14 = vadd.f32 %v2554_v63, %v548_v13  ;;  %v629_v22 = vmul.f32 0.2, %v557_v15  ;;  %vm613_vm2 = vcmp.ge.f32.partialorder %v557_v15, 0.0 }
 0x213   :  { %v1968_v16 = vpop.f32.mrf.mxu1 }
 0x214   :  { %v560_v17 = vadd.f32 %v1968_v16, %v2554_v63  ;;  %v627_v19 = vmul.f32 0.2, %v549_v14  ;;  %vm611_vm1 = vcmp.ge.f32.partialorder %v549_v14, 0.0  ;;  %v645_v30 = vsel %vm613_vm2, %v557_v15, %v629_v22 }
 0x215   :  { %v551_v18 = vpop.f32.mrf.mxu1 }
 0x216   :  { %vm614_vm0 = vcmp.ge.f32.partialorder %v560_v17, 0.0  ;;  %v630_v20 = vmul.f32 0.2, %v560_v17  ;;  %v552_v21 = vadd.f32 %v2554_v63, %v551_v18  ;;  %v643_v28 = vsel %vm611_vm1, %v549_v14, %v627_v19 }
 0x217   :  { %v1971_v23 = vpop.f32.mrf.mxu1 }
 0x218   :  { %vm612_vm3 = vcmp.ge.f32.partialorder %v552_v21, 0.0  ;;  %v628_v24 = vmul.f32 0.2, %v552_v21  ;;  %v646_v25 = vsel %vm614_vm0, %v560_v17, %v630_v20  ;;  %v573_v31 = vadd.f32 %v1971_v23, %v2554_v63 }
 0x219   :  { %v564_v26 = vpop.f32.mrf.mxu1  ;;  %v964_v34 = vpack.c.bf16 %v646_v25, %v645_v30  ;;  %v2181_v25 = vld [vmem:[#allocation14 + $0x10] sm:$0xff]  }
 0x21a   :  { %v565_v27 = vadd.f32 %v2554_v63, %v564_v26  ;;  %v644_v29 = vsel %vm612_vm3, %v552_v21, %v628_v24  ;;  %v633_v41 = vmul.f32 0.2, %v573_v31  ;;  %vm617_vm6 = vcmp.ge.f32.partialorder %v573_v31, 0.0  ;;  %v2180_v24 = vld [vmem:[#allocation14 + $0x18] sm:$0xff]   ;;  %v2183_v26 = vld [vmem:[#allocation14] sm:$0xff]  }
 0x21b   :  { %v1972_v32 = vpop.f32.mrf.mxu1  ;;  %v963_v33 = vpack.c.bf16 %v644_v29, %v643_v28 }
 0x21c   :  { %v576_v35 = vadd.f32 %v1972_v32, %v2554_v63  ;;  %v631_v38 = vmul.f32 0.2, %v565_v27  ;;  %vm615_vm5 = vcmp.ge.f32.partialorder %v565_v27, 0.0  ;;  %v649_v54 = vsel %vm617_vm6, %v573_v31, %v633_v41 }
 0x21d   :  { %v567_v37 = vpop.f32.mrf.mxu1  ;;  %2029 = vmatprep.mubr.bf16.mxu1 %v963_v33 }
 0x21e   :  { %vm618_vm4 = vcmp.ge.f32.partialorder %v576_v35, 0.0  ;;  %v634_v39 = vmul.f32 0.2, %v576_v35  ;;  %v568_v40 = vadd.f32 %v2554_v63, %v567_v37  ;;  %2030 = vmatmul.mubr.bf16.vlgmr.msra.gmra.mxu1 %v964_v34  ;;  %v647_v48 = vsel %vm615_vm5, %v565_v27, %v631_v38 }
 0x21f   :  { %v1975_v42 = vpop.f32.mrf.mxu1  ;;  %2078 = vmatpush3.bf16.msra.mxu1 %v2176_v11 }
 0x220   :  { %vm616_vm7 = vcmp.ge.f32.partialorder %v568_v40, 0.0  ;;  %v632_v43 = vmul.f32 0.2, %v568_v40  ;;  %2079 = vmatprep.subr.bf16.mxu1 %v2177_v36  ;;  %v650_v46 = vsel %vm618_vm4, %v576_v35, %v634_v39  ;;  %v589_v51 = vadd.f32 %v1975_v42, %v2554_v63 }
 0x221   :  { %v580_v45 = vpop.f32.mrf.mxu1  ;;  %v966_v56 = vpack.c.bf16 %v650_v46, %v649_v54 }
 0x222   :  { %v581_v47 = vadd.f32 %v2554_v63, %v580_v45  ;;  %v648_v49 = vsel %vm616_vm7, %v568_v40, %v632_v43  ;;  %v637_v62 = vmul.f32 0.2, %v589_v51  ;;  %vm621_vm10 = vcmp.ge.f32.partialorder %v589_v51, 0.0  ;;  %v2575_v40 = vld [vmem:[%s2630_s10] ss:$0 sm:$0xff] }
 0x223   :  { %v1976_v52 = vpop.f32.mrf.mxu1  ;;  %v965_v53 = vpack.c.bf16 %v648_v49, %v647_v48  ;;  %2080 = vmatpush3.bf16.msra.mxu1 %v2177_v36 }
 0x224   :  { %v592_v55 = vadd.f32 %v1976_v52, %v2554_v63  ;;  %2081 = vmatprep.subr.bf16.mxu1 %v2178_v44  ;;  %v635_v59 = vmul.f32 0.2, %v581_v47  ;;  %vm619_vm9 = vcmp.ge.f32.partialorder %v581_v47, 0.0  ;;  %v653_v9 = vsel %vm621_vm10, %v589_v51, %v637_v62 }
 0x225   :  { %v583_v58 = vpop.f32.mrf.mxu1  ;;  %2033 = vmatprep.mubr.bf16.mxu1 %v965_v53 }
 0x226   :  { %vm622_vm8 = vcmp.ge.f32.partialorder %v592_v55, 0.0  ;;  %v638_v60 = vmul.f32 0.2, %v592_v55  ;;  %v584_v61 = vadd.f32 %v2554_v63, %v583_v58  ;;  %2034 = vmatmul.mubr.bf16.gmra.mxu1 %v966_v56  ;;  %v651_v4 = vsel %vm619_vm9, %v581_v47, %v635_v59 }
 0x227   :  { %v1979_v50 = vpop.f32.mrf.mxu1  ;;  %2082 = vmatpush3.bf16.msra.mxu1 %v2178_v44 }
 0x228   :  { %vm620_vm11 = vcmp.ge.f32.partialorder %v584_v61, 0.0  ;;  %v636_v0 = vmul.f32 0.2, %v584_v61  ;;  %2083 = vmatprep.subr.bf16.mxu1 %v2179_v57  ;;  %v654_v2 = vsel %vm622_vm8, %v592_v55, %v638_v60  ;;  %v605_v6 = vadd.f32 %v1979_v50, %v2554_v63 }
 0x229   :  { %v596_v1 = vpop.f32.mrf.mxu1  ;;  %v968_v11 = vpack.c.bf16 %v654_v2, %v653_v9 }
 0x22a   :  { %v597_v3 = vadd.f32 %v2554_v63, %v596_v1  ;;  %v652_v5 = vsel %vm620_vm11, %v584_v61, %v636_v0  ;;  %v641_v16 = vmul.f32 0.2, %v605_v6  ;;  %vm625_vm14 = vcmp.ge.f32.partialorder %v605_v6, 0.0 }
 0x22b   :  { %v1980_v7 = vpop.f32.mrf.mxu1  ;;  %v967_v8 = vpack.c.bf16 %v652_v5, %v651_v4  ;;  %2084 = vmatpush3.bf16.msra.mxu1 %v2179_v57 }
 0x22c   :  { %v608_v10 = vadd.f32 %v1980_v7, %v2554_v63  ;;  %v639_v13 = vmul.f32 0.2, %v597_v3  ;;  %vm623_vm13 = vcmp.ge.f32.partialorder %v597_v3, 0.0  ;;  %v657_v22 = vsel %vm625_vm14, %v605_v6, %v641_v16  ;;  %2085 = vmatprep.subr.bf16.mxu1 %v2180_v24 }
 0x22d   :  { %v599_v12 = vpop.f32.mrf.mxu1  ;;  %2037 = vmatprep.mubr.bf16.mxu1 %v967_v8 }
 0x22e   :  { %vm626_vm12 = vcmp.ge.f32.partialorder %v608_v10, 0.0  ;;  %v642_v14 = vmul.f32 0.2, %v608_v10  ;;  %v600_v15 = vadd.f32 %v2554_v63, %v599_v12  ;;  %2038 = vmatmul.mubr.bf16.gmra.mxu1 %v968_v11  ;;  %v655_v19 = vsel %vm623_vm13, %v597_v3, %v639_v13  ;;  %v2182_v63 = vld [vmem:[#allocation14 + $0x8] sm:$0xff]  }
 0x22f   :  { %2086 = vmatpush3.bf16.msra.mxu1 %v2180_v24  ;;  %v2063_v27 = vpop.f32.mrf.mxu0 }
 0x230   :  { %vm624_vm15 = vcmp.ge.f32.partialorder %v600_v15, 0.0  ;;  %v640_v17 = vmul.f32 0.2, %v600_v15  ;;  %v658_v18 = vsel %vm626_vm12, %v608_v10, %v642_v14  ;;  %2087 = vmatprep.subr.bf16.mxu1 %v2181_v25 }
 0x231   :  { %v970_v23 = vpack.c.bf16 %v658_v18, %v657_v22  ;;  %v1214_v28 = vpop.f32.mrf.mxu0 }
 0x232   :  { %v656_v20 = vsel %vm624_vm15, %v600_v15, %v640_v17 }
 0x233   :  { %v969_v21 = vpack.c.bf16 %v656_v20, %v655_v19  ;;  %2088 = vmatpush3.bf16.msra.mxu1 %v2181_v25  ;;  %v2064_v29 = vpop.f32.mrf.mxu0 }
 0x234   :  { %2089 = vmatprep.subr.bf16.mxu1 %v2182_v63 }
 0x235   :  { %2041 = vmatprep.mubr.bf16.mxu1 %v969_v21  ;;  %v1217_v30 = vpop.f32.mrf.mxu0 }
 0x236   :  { %2042 = vmatmul.mubr.bf16.gmra.mxu1 %v970_v23 }
 0x237   :  { %2090 = vmatpush3.bf16.msra.mxu1 %v2182_v63  ;;  %v2067_v31 = vpop.f32.mrf.mxu0 }
 0x238   :  { %2091 = vmatprep.subr.bf16.mxu1 %v2183_v26 }
 0x239   :  { %v1230_v32 = vpop.f32.mrf.mxu0 }
 0x23b   :  { %2092 = vmatpush3.bf16.msra.mxu1 %v2183_v26  ;;  %v2068_v33 = vpop.f32.mrf.mxu0 }
 0x23d   :  { %v1233_v34 = vpop.f32.mrf.mxu0 }
 0x23f   :  { %v2071_v36 = vpop.f32.mrf.mxu0 }
 0x241   :  { %v1246_v43 = vpop.f32.mrf.mxu0 }
 0x243   :  { %v2072_v52 = vpop.f32.mrf.mxu0 }
 0x245   :  { %v1249_v50 = vpop.f32.mrf.mxu0 }
 0x247   :  { %v2075_v12 = vpop.f32.mrf.mxu0 }
 0x249   :  { %v1262_v22 = vpop.f32.mrf.mxu0 }
 0x2de   :  { %v2031_v35 = vpop.f32.mrf.mxu1 }
 0x2df   :  { %v1223_v38 = vadd.f32 %v2063_v27, %v2031_v35  ;;  %v2076_v35 = vpop.f32.mrf.mxu0 }
 0x2e0   :  { %v1069_v37 = vpop.f32.mrf.mxu1 }
 0x2e1   :  { %v1215_v39 = vadd.f32 %v1214_v28, %v1069_v37  ;;  %v1286_v45 = vadd.f32 %v2575_v40, %v1223_v38 }
 0x2e2   :  { %v2032_v41 = vpop.f32.mrf.mxu1 }
 0x2e3   :  { %v1226_v42 = vadd.f32 %v2064_v29, %v2032_v41  ;;  %v1284_v46 = vadd.f32 %v2575_v40, %v1215_v39  ;;  %v1318_v55 = vmul.f32 0.2, %v1286_v45  ;;  %vm1302_vm3 = vcmp.ge.f32.partialorder %v1286_v45, 0.0 }
 0x2e4   :  { %v1072_v44 = vpop.f32.mrf.mxu1 }
 0x2e5   :  { %v1287_v47 = vadd.f32 %v2575_v40, %v1226_v42  ;;  %v1218_v48 = vadd.f32 %v1217_v30, %v1072_v44  ;;  %v1316_v56 = vmul.f32 0.2, %v1284_v46  ;;  %vm1300_vm1 = vcmp.ge.f32.partialorder %v1284_v46, 0.0 }
 0x2e6   :  { %v2035_v49 = vpop.f32.mrf.mxu1  ;;  %v1334_v6 = vsel %vm1302_vm3, %v1286_v45, %v1318_v55 }
 0x2e7   :  { %v1319_v51 = vmul.f32 0.2, %v1287_v47  ;;  %v1285_v53 = vadd.f32 %v2575_v40, %v1218_v48  ;;  %vm1303_vm0 = vcmp.ge.f32.partialorder %v1287_v47, 0.0  ;;  %v1239_v59 = vadd.f32 %v2067_v31, %v2035_v49 }
 0x2e8   :  { %v1085_v54 = vpop.f32.mrf.mxu1  ;;  %v1332_v5 = vsel %vm1300_vm1, %v1284_v46, %v1316_v56 }
 0x2e9   :  { %v1231_v57 = vadd.f32 %v1230_v32, %v1085_v54  ;;  %vm1301_vm2 = vcmp.ge.f32.partialorder %v1285_v53, 0.0  ;;  %v1317_v58 = vmul.f32 0.2, %v1285_v53  ;;  %v1335_v62 = vsel %vm1303_vm0, %v1287_v47, %v1319_v51  ;;  %v1265_v47 = vpop.f32.mrf.mxu0 }
 0x2ea   :  { %v2036_v60 = vpop.f32.mrf.mxu1  ;;  %v1290_v7 = vadd.f32 %v2575_v40, %v1239_v59  ;;  %v1349_v10 = vpack.c.bf16 %v1335_v62, %v1334_v6 }
 0x2eb   :  { %v1242_v61 = vadd.f32 %v2068_v33, %v2036_v60  ;;  %v1288_v0 = vadd.f32 %v2575_v40, %v1231_v57  ;;  %v1333_v2 = vsel %vm1301_vm2, %v1285_v53, %v1317_v58 }
 0x2ec   :  { %v1088_v1 = vpop.f32.mrf.mxu1  ;;  %v1348_v9 = vpack.c.bf16 %v1333_v2, %v1332_v5  ;;  %v1322_v18 = vmul.f32 0.2, %v1290_v7  ;;  %vm1306_vm7 = vcmp.ge.f32.partialorder %v1290_v7, 0.0 }
 0x2ed   :  { %v1291_v3 = vadd.f32 %v2575_v40, %v1242_v61  ;;  %v1234_v4 = vadd.f32 %v1233_v34, %v1088_v1  ;;  %v1320_v13 = vmul.f32 0.2, %v1288_v0  ;;  %vm1304_vm6 = vcmp.ge.f32.partialorder %v1288_v0, 0.0 }
 0x2ee   :  { %v2039_v8 = vpop.f32.mrf.mxu1  ;;  %2093 = vmatprep.mubr.bf16.mxu1 %v1348_v9  ;;  %v1338_v32 = vsel %vm1306_vm7, %v1290_v7, %v1322_v18 }
 0x2ef   :  { %v1289_v11 = vadd.f32 %v2575_v40, %v1234_v4  ;;  %v1323_v14 = vmul.f32 0.2, %v1291_v3  ;;  %vm1307_vm4 = vcmp.ge.f32.partialorder %v1291_v3, 0.0  ;;  %2094 = vmatmul.mubr.bf16.vlgmr.msra.gmra.mxu1 %v1349_v10  ;;  %v1255_v19 = vadd.f32 %v2071_v36, %v2039_v8 }
 0x2f0   :  { %v1101_v15 = vpop.f32.mrf.mxu1  ;;  %v1336_v28 = vsel %vm1304_vm6, %v1288_v0, %v1320_v13 }
 0x2f1   :  { %vm1305_vm5 = vcmp.ge.f32.partialorder %v1289_v11, 0.0  ;;  %v1321_v16 = vmul.f32 0.2, %v1289_v11  ;;  %v1247_v17 = vadd.f32 %v1246_v43, %v1101_v15  ;;  %v1339_v63 = vsel %vm1307_vm4, %v1291_v3, %v1323_v14 }
 0x2f2   :  { %v2040_v20 = vpop.f32.mrf.mxu1  ;;  %v1294_v29 = vadd.f32 %v2575_v40, %v1255_v19  ;;  %v1351_v34 = vpack.c.bf16 %v1339_v63, %v1338_v32 }
 0x2f3   :  { %v1258_v21 = vadd.f32 %v2072_v52, %v2040_v20  ;;  %v1292_v23 = vadd.f32 %v2575_v40, %v1247_v17  ;;  %v1337_v25 = vsel %vm1305_vm5, %v1289_v11, %v1321_v16 }
 0x2f4   :  { %v1104_v24 = vpop.f32.mrf.mxu1  ;;  %v1350_v31 = vpack.c.bf16 %v1337_v25, %v1336_v28  ;;  %v1326_v42 = vmul.f32 0.2, %v1294_v29  ;;  %vm1310_vm11 = vcmp.ge.f32.partialorder %v1294_v29, 0.0 }
 0x2f5   :  { %v1295_v26 = vadd.f32 %v2575_v40, %v1258_v21  ;;  %v1250_v27 = vadd.f32 %v1249_v50, %v1104_v24  ;;  %v1324_v36 = vmul.f32 0.2, %v1292_v23  ;;  %vm1308_vm10 = vcmp.ge.f32.partialorder %v1292_v23, 0.0 }
 0x2f6   :  { %v2043_v30 = vpop.f32.mrf.mxu1  ;;  %2097 = vmatprep.mubr.bf16.mxu1 %v1350_v31  ;;  %v1342_v57 = vsel %vm1310_vm11, %v1294_v29, %v1326_v42 }
 0x2f7   :  { %v1293_v33 = vadd.f32 %v2575_v40, %v1250_v27  ;;  %v1327_v37 = vmul.f32 0.2, %v1295_v26  ;;  %vm1311_vm8 = vcmp.ge.f32.partialorder %v1295_v26, 0.0  ;;  %2098 = vmatmul.mubr.bf16.gmra.mxu1 %v1351_v34  ;;  %v1271_v43 = vadd.f32 %v2075_v12, %v2043_v30 }
 0x2f8   :  { %v1117_v38 = vpop.f32.mrf.mxu1  ;;  %v1340_v54 = vsel %vm1308_vm10, %v1292_v23, %v1324_v36 }
 0x2f9   :  { %vm1309_vm9 = vcmp.ge.f32.partialorder %v1293_v33, 0.0  ;;  %v1325_v39 = vmul.f32 0.2, %v1293_v33  ;;  %v1263_v41 = vadd.f32 %v1262_v22, %v1117_v38  ;;  %v1343_v51 = vsel %vm1311_vm8, %v1295_v26, %v1327_v37 }
 0x2fa   :  { %v2044_v44 = vpop.f32.mrf.mxu1  ;;  %v1298_v55 = vadd.f32 %v2575_v40, %v1271_v43  ;;  %v1353_v60 = vpack.c.bf16 %v1343_v51, %v1342_v57 }
 0x2fb   :  { %v1296_v45 = vadd.f32 %v2575_v40, %v1263_v41  ;;  %v1274_v46 = vadd.f32 %v2076_v35, %v2044_v44  ;;  %v1341_v49 = vsel %vm1309_vm9, %v1293_v33, %v1325_v39 }
 0x2fc   :  { %v1120_v48 = vpop.f32.mrf.mxu1  ;;  %v1352_v56 = vpack.c.bf16 %v1341_v49, %v1340_v54  ;;  %v1330_v50 = vmul.f32 0.2, %v1298_v55  ;;  %vm1314_vm15 = vcmp.ge.f32.partialorder %v1298_v55, 0.0 }
 0x2fd   :  { %v1299_v52 = vadd.f32 %v2575_v40, %v1274_v46  ;;  %v1266_v53 = vadd.f32 %v1265_v47, %v1120_v48  ;;  %v1328_v58 = vmul.f32 0.2, %v1296_v45  ;;  %vm1312_vm12 = vcmp.ge.f32.partialorder %v1296_v45, 0.0 }
 0x2fe   :  { %2101 = vmatprep.mubr.bf16.mxu1 %v1352_v56  ;;  %v1346_v4 = vsel %vm1314_vm15, %v1298_v55, %v1330_v50 }
 0x2ff   :  { %v1297_v59 = vadd.f32 %v2575_v40, %v1266_v53  ;;  %v1331_v61 = vmul.f32 0.2, %v1299_v52  ;;  %vm1315_vm13 = vcmp.ge.f32.partialorder %v1299_v52, 0.0  ;;  %2102 = vmatmul.mubr.bf16.gmra.mxu1 %v1353_v60  ;;  %v1344_v0 = vsel %vm1312_vm12, %v1296_v45, %v1328_v58  ;;  %v2596_v40 = vld [vmem:[%s2632_s12] ss:$0 sm:$0xff]  ;;  %s2386_s12 = smov [#allocation16]  }
 0x300   :  { %s1657_s16 = sshll.u32 %s2386_s12, 4  ;;  %s1658_s16 = int_to_ptr.vmem [resolvable:$true] %s1657_s16 }
 0x301   :  { %vm1313_vm14 = vcmp.ge.f32.partialorder %v1297_v59, 0.0  ;;  %v1329_v62 = vmul.f32 0.2, %v1297_v59  ;;  %v1347_v3 = vsel %vm1315_vm13, %v1299_v52, %v1331_v61  ;;  %s2344_s8 = scalar_lea.vmem %s1658_s16, 1024  ;;  %p2349_p13 = scmp.lt.s32.totalorder %s1658_s16, %s1658_s16 }
 0x302   :  { %v1355_v5 = vpack.c.bf16 %v1347_v3, %v1346_v4  ;;  %p2345_p12 = scmp.ne.s32.totalorder %s1658_s16, %s2344_s8  ;;  %p2350_p0 = scmp.lt.s32.totalorder %s2344_s8, %s2344_s8 }
 0x303   :  { %v1345_v1 = vsel %vm1313_vm14, %v1297_v59, %v1329_v62 }
 0x304   :  { %v1354_v2 = vpack.c.bf16 %v1345_v1, %v1344_v0  ;;  %p2351_p1 = por %p2350_p0, %p2349_p13 }
 0x306   :  { %2105 = vmatprep.mubr.bf16.mxu1 %v1354_v2  ;;  %p2352_p2 = pnand %p2351_p1, %p2345_p12 }
 0x307   :  { %2106 = vmatmul.mubr.bf16.gmra.mxu1 %v1355_v5 }
 0x3af   :  { %v2095_v6 = vpop.f32.mrf.mxu1 }
 0x3b0   :  { %v1470_v7 = vadd.f32 %v2095_v6, %v2596_v40 }
 0x3b1   :  { %v1461_v8 = vpop.f32.mrf.mxu1 }
 0x3b2   :  { %v1462_v9 = vadd.f32 %v2596_v40, %v1461_v8  ;;  %v1542_v10 = vmul.f32 0.2, %v1470_v7  ;;  %vm1526_vm0 = vcmp.ge.f32.partialorder %v1470_v7, 0.0 }
 0x3b3   :  { %v2096_v11 = vpop.f32.mrf.mxu1 }
 0x3b4   :  { %v1473_v12 = vadd.f32 %v2096_v11, %v2596_v40  ;;  %v1540_v14 = vmul.f32 0.2, %v1462_v9  ;;  %v1558_v17 = vsel %vm1526_vm0, %v1470_v7, %v1542_v10  ;;  %vm1524_vm2 = vcmp.ge.f32.partialorder %v1462_v9, 0.0 }
 0x3b5   :  { %v1464_v13 = vpop.f32.mrf.mxu1 }
 0x3b6   :  { %vm1527_vm1 = vcmp.ge.f32.partialorder %v1473_v12, 0.0  ;;  %v1543_v15 = vmul.f32 0.2, %v1473_v12  ;;  %v1465_v16 = vadd.f32 %v2596_v40, %v1464_v13  ;;  %v1556_v24 = vsel %vm1524_vm2, %v1462_v9, %v1540_v14 }
 0x3b7   :  { %v2099_v18 = vpop.f32.mrf.mxu1 }
 0x3b8   :  { %v1559_v19 = vsel %vm1527_vm1, %v1473_v12, %v1543_v15  ;;  %vm1525_vm3 = vcmp.ge.f32.partialorder %v1465_v16, 0.0  ;;  %v1541_v20 = vmul.f32 0.2, %v1465_v16  ;;  %v1486_v21 = vadd.f32 %v2099_v18, %v2596_v40 }
 0x3b9   :  { %v1782_v22 = vpack.c.bf16 %v1559_v19, %v1558_v17  ;;  %v1477_v23 = vpop.f32.mrf.mxu1 }
 0x3ba   :  { %v1557_v25 = vsel %vm1525_vm3, %v1465_v16, %v1541_v20  ;;  %v1478_v63 = vadd.f32 %v2596_v40, %v1477_v23  ;;  %v1546_v27 = vmul.f32 0.2, %v1486_v21  ;;  %vm1530_vm4 = vcmp.ge.f32.partialorder %v1486_v21, 0.0 }
 0x3bb   :  { %1814 = vst [vmem:[#allocation16 + $0x8] sm:$0xff] %v1782_v22   ;;  %v1777_v26 = vpack.c.bf16 %v1557_v25, %v1556_v24  ;;  %v2100_v28 = vpop.f32.mrf.mxu1 }
 0x3bc   :  { %v1489_v29 = vadd.f32 %v2100_v28, %v2596_v40  ;;  %v1544_v31 = vmul.f32 0.2, %v1478_v63  ;;  %v1562_v34 = vsel %vm1530_vm4, %v1486_v21, %v1546_v27  ;;  %vm1528_vm6 = vcmp.ge.f32.partialorder %v1478_v63, 0.0 }
 0x3bd   :  { %1778 = vst [vmem:[#allocation16] sm:$0xff] %v1777_v26   ;;  %v1480_v30 = vpop.f32.mrf.mxu1 }
 0x3be   :  { %vm1531_vm5 = vcmp.ge.f32.partialorder %v1489_v29, 0.0  ;;  %v1547_v32 = vmul.f32 0.2, %v1489_v29  ;;  %v1481_v33 = vadd.f32 %v2596_v40, %v1480_v30  ;;  %v1560_v42 = vsel %vm1528_vm6, %v1478_v63, %v1544_v31 }
 0x3bf   :  { %v2103_v35 = vpop.f32.mrf.mxu1 }
 0x3c0   :  { %v1563_v36 = vsel %vm1531_vm5, %v1489_v29, %v1547_v32  ;;  %vm1529_vm7 = vcmp.ge.f32.partialorder %v1481_v33, 0.0  ;;  %v1545_v37 = vmul.f32 0.2, %v1481_v33  ;;  %v1502_v38 = vadd.f32 %v2103_v35, %v2596_v40 }
 0x3c1   :  { %v1792_v39 = vpack.c.bf16 %v1563_v36, %v1562_v34  ;;  %v1493_v41 = vpop.f32.mrf.mxu1 }
 0x3c2   :  { %v1561_v43 = vsel %vm1529_vm7, %v1481_v33, %v1545_v37  ;;  %v1494_v44 = vadd.f32 %v2596_v40, %v1493_v41  ;;  %v1550_v46 = vmul.f32 0.2, %v1502_v38  ;;  %vm1534_vm8 = vcmp.ge.f32.partialorder %v1502_v38, 0.0 }
 0x3c3   :  { %1816 = vst [vmem:[#allocation16 + $0x18] sm:$0xff] %v1792_v39   ;;  %v1787_v45 = vpack.c.bf16 %v1561_v43, %v1560_v42  ;;  %v2104_v47 = vpop.f32.mrf.mxu1 }
 0x3c4   :  { %v1505_v48 = vadd.f32 %v2104_v47, %v2596_v40  ;;  %v1548_v51 = vmul.f32 0.2, %v1494_v44  ;;  %v1566_v54 = vsel %vm1534_vm8, %v1502_v38, %v1550_v46  ;;  %vm1532_vm10 = vcmp.ge.f32.partialorder %v1494_v44, 0.0 }
 0x3c5   :  { %1815 = vst [vmem:[#allocation16 + $0x10] sm:$0xff] %v1787_v45   ;;  %v1496_v49 = vpop.f32.mrf.mxu1 }
 0x3c6   :  { %vm1535_vm9 = vcmp.ge.f32.partialorder %v1505_v48, 0.0  ;;  %v1551_v52 = vmul.f32 0.2, %v1505_v48  ;;  %v1497_v53 = vadd.f32 %v2596_v40, %v1496_v49  ;;  %v1564_v61 = vsel %vm1532_vm10, %v1494_v44, %v1548_v51 }
 0x3c7   :  { %v2107_v55 = vpop.f32.mrf.mxu1 }
 0x3c8   :  { %v1567_v56 = vsel %vm1535_vm9, %v1505_v48, %v1551_v52  ;;  %vm1533_vm11 = vcmp.ge.f32.partialorder %v1497_v53, 0.0  ;;  %v1549_v57 = vmul.f32 0.2, %v1497_v53  ;;  %v1518_v58 = vadd.f32 %v2107_v55, %v2596_v40 }
 0x3c9   :  { %v1802_v59 = vpack.c.bf16 %v1567_v56, %v1566_v54  ;;  %v1509_v60 = vpop.f32.mrf.mxu1 }
 0x3ca   :  { %v1565_v62 = vsel %vm1533_vm11, %v1497_v53, %v1549_v57  ;;  %v1510_v50 = vadd.f32 %v2596_v40, %v1509_v60  ;;  %v1554_v2 = vmul.f32 0.2, %v1518_v58  ;;  %vm1538_vm12 = vcmp.ge.f32.partialorder %v1518_v58, 0.0 }
 0x3cb   :  { %1818 = vst [vmem:[#allocation16 + $0x28] sm:$0xff] %v1802_v59   ;;  %v1797_v0 = vpack.c.bf16 %v1565_v62, %v1564_v61  ;;  %v2108_v1 = vpop.f32.mrf.mxu1 }
 0x3cc   :  { %v1521_v3 = vadd.f32 %v2108_v1, %v2596_v40  ;;  %v1552_v5 = vmul.f32 0.2, %v1510_v50  ;;  %vm1536_vm14 = vcmp.ge.f32.partialorder %v1510_v50, 0.0  ;;  %v1570_v8 = vsel %vm1538_vm12, %v1518_v58, %v1554_v2 }
 0x3cd   :  { %1817 = vst [vmem:[#allocation16 + $0x20] sm:$0xff] %v1797_v0   ;;  %v1512_v4 = vpop.f32.mrf.mxu1 }
 0x3ce   :  { %vm1539_vm13 = vcmp.ge.f32.partialorder %v1521_v3, 0.0  ;;  %v1555_v6 = vmul.f32 0.2, %v1521_v3  ;;  %v1513_v7 = vadd.f32 %v2596_v40, %v1512_v4  ;;  %v1568_v12 = vsel %vm1536_vm14, %v1510_v50, %v1552_v5 }
 0x3d0   :  { %v1571_v9 = vsel %vm1539_vm13, %v1521_v3, %v1555_v6  ;;  %vm1537_vm15 = vcmp.ge.f32.partialorder %v1513_v7, 0.0  ;;  %v1553_v10 = vmul.f32 0.2, %v1513_v7 }
 0x3d1   :  { %v1812_v11 = vpack.c.bf16 %v1571_v9, %v1570_v8 }
 0x3d2   :  { %v1569_v13 = vsel %vm1537_vm15, %v1513_v7, %v1553_v10 }
 0x3d3   :  { %1820 = vst [vmem:[#allocation16 + $0x38] sm:$0xff] %v1812_v11   ;;  %v1807_v14 = vpack.c.bf16 %v1569_v13, %v1568_v12 }
 0x3d5   :  { %1819 = vst [vmem:[#allocation16 + $0x30] sm:$0xff] %v1807_v14  }
 0x3d6   :  { %2355 = shalt.err (!%p2352_p2)
}
 0x3d7   :  { %1663 = dma.vmem_to_hbm [thread:$0]  %s1658_s16, 1024, %s2633_s13, [#allocation4], %s2378_s30, %s2378_s30, %s2379_s14  }
 0x3d8   :  { %2374 = dma.done.wait [#allocation4], 1024  }
 0x3d9   :  { %2375 = vsyncadd [#allocation4], 4294966272 }
 0x3da   :  { %1667 = vsyncpa [#allocation3], 1 }
 0x3db   :  { %1668 = vsyncpa [#allocation6], 1 }
 0x3dc   :  { %1669 = vsyncpa [#allocation9], 1 }
 0x3dd   :  { %1670 = vsyncpa [#allocation12], 1 }
 0x3de   :  { %1671 = vsyncpa [#allocation15], 1 }
 0x3df   :  { %1672 = vsyncpa [#allocation4], 1 }

</bundles_post_ra>
